<compile_context>
chip_gen: v7x
topology: tpu7x:2x2x1
jax: 0.10.0
libtpu: 0.0.40
codegen_flags: <defaults>
</compile_context>

<pallas_src>
import math
from functools import partial

import jax
import jax.numpy as jnp
from jax import lax
from jax.experimental import pallas as pl
from jax.experimental.pallas import tpu as pltpu


def _choose_tile(n, target, align):
    """Largest t <= target with t % align == 0 and n % t == 0 (n align-divisible)."""
    if n % align != 0:
        return n
    t = min(target, n)
    t = (t // align) * align
    while t >= align:
        if n % t == 0:
            return t
        t -= align
    return n


# ---------------- fused RMSNorm(m) + QKV + gate projection ----------------
def _norm_proj_kernel(x_ref, wn_ref, w_ref, b_ref, q_ref, k_ref, v_ref, g_ref,
                      *, eps, hd):
    x = x_ref[...].astype(jnp.float32)                              # [tm, c_m]
    ms = jnp.mean(x * x, axis=-1, keepdims=True)
    xn = x * lax.rsqrt(ms + eps) * wn_ref[...]                      # [tm, c_m] f32
    y = jnp.dot(xn.astype(w_ref.dtype), w_ref[...],
                preferred_element_type=jnp.float32) + b_ref[...]    # [tm, 3*hd + c_m] f32
    q_ref[...] = y[:, :hd].astype(q_ref.dtype)
    k_ref[...] = y[:, hd:2 * hd].astype(k_ref.dtype)
    v_ref[...] = y[:, 2 * hd:3 * hd].astype(v_ref.dtype)
    g_ref[...] = y[:, 3 * hd:].astype(g_ref.dtype)


def fused_norm_qkvg(x, wn, w, b, hd, eps, row_tile=512):
    # x: [N, c_m] f32; w: [c_m, 3*hd + c_m] bf16 (1/sqrt(D) folded into Q cols); b: [1, W] f32
    N, c_m = x.shape
    W = w.shape[1]
    tm = _choose_tile(N, row_tile, 8)
    row_spec = lambda i: (i, 0)
    return pl.pallas_call(
        partial(_norm_proj_kernel, eps=eps, hd=hd),
        out_shape=(jax.ShapeDtypeStruct((N, hd), jnp.bfloat16),
                   jax.ShapeDtypeStruct((N, hd), jnp.bfloat16),
                   jax.ShapeDtypeStruct((N, hd), jnp.bfloat16),
                   jax.ShapeDtypeStruct((N, c_m), jnp.bfloat16)),
        grid=(N // tm,),
        in_specs=[pl.BlockSpec((tm, c_m), row_spec),
                  pl.BlockSpec((1, c_m), lambda i: (0, 0)),
                  pl.BlockSpec((c_m, W), lambda i: (0, 0)),
                  pl.BlockSpec((1, W), lambda i: (0, 0))],
        out_specs=(pl.BlockSpec((tm, hd), row_spec),
                   pl.BlockSpec((tm, hd), row_spec),
                   pl.BlockSpec((tm, hd), row_spec),
                   pl.BlockSpec((tm, c_m), row_spec)),
        compiler_params=pltpu.CompilerParams(dimension_semantics=("parallel",)),
    )(x, wn, w, b)


# ---------------- fused RMSNorm(z) + pair-bias projection (MXU) ----------------
def _pair_bias_kernel(z_ref, wn_ref, wz_ref, o_ref, *, eps):
    z = z_ref[...].astype(jnp.float32)                              # [tr, c_z]
    ms = jnp.mean(z * z, axis=-1, keepdims=True)
    zn = z * lax.rsqrt(ms + eps) * wn_ref[...]                      # [tr, c_z] f32
    # [H, c_z] x [tr, c_z]^T on the MXU -> [H, tr] (lane-dense output slab)
    b = lax.dot_general(wz_ref[...], zn.astype(wz_ref.dtype),
                        (((1,), (1,)), ((), ())),
                        preferred_element_type=jnp.float32)
    o_ref[...] = b.astype(o_ref.dtype)


def pair_bias(z2, wn, wz, eps, row_target=2048):
    # z2: [S*S, c_z] f32 (flat view of z); wn: [1, c_z] f32; wz: [H, c_z] bf16 -> [H, S*S] bf16
    R, c_z = z2.shape
    H = wz.shape[0]
    tr = _choose_tile(R, row_target, 8)
    return pl.pallas_call(
        partial(_pair_bias_kernel, eps=eps),
        out_shape=jax.ShapeDtypeStruct((H, R), jnp.bfloat16),
        grid=(R // tr,),
        in_specs=[pl.BlockSpec((tr, c_z), lambda i: (i, 0)),
                  pl.BlockSpec((1, c_z), lambda i: (0, 0)),
                  pl.BlockSpec((H, c_z), lambda i: (0, 0))],
        out_specs=pl.BlockSpec((H, tr), lambda i: (0, i)),
        compiler_params=pltpu.CompilerParams(dimension_semantics=("parallel",)),
    )(z2, wn, wz)


# ---------------- flash-style biased attention (row-batched, all heads per tile) ----------------
def _flash_attn_kernel(q_ref, k_ref, v_ref, b_ref, mb_ref, o_ref,
                       q_scr, m_scr, l_scr, acc_scr, *, num_heads, head_dim):
    ki = pl.program_id(2)
    nk = pl.num_programs(2)
    H, D = num_heads, head_dim

    @pl.when(ki == 0)
    def _():
        m_scr[...] = jnp.full(m_scr.shape, -jnp.inf, jnp.float32)
        l_scr[...] = jnp.zeros(l_scr.shape, jnp.float32)
        acc_scr[...] = jnp.zeros(acc_scr.shape, jnp.float32)
        # hoist the per-head q lane-slices out of the kv loop (done once per (b, q) tile)
        q_full = q_ref[...]                                         # [tb, tq, H*D] bf16
        for h in range(H):
            q_scr[h] = q_full[:, :, h * D:(h + 1) * D]              # [tb, tq, D]

    k_full = k_ref[...]                                             # [tb, tk, H*D] bf16
    v_full = v_ref[...]
    mask_bias = mb_ref[...].astype(jnp.float32)                     # [tq, tk] (shared across b, h)

    for h in range(H):
        lo = h * D
        q_h = q_scr[h]                                              # [tb, tq, D] bf16 (scale pre-folded)
        k_h = k_full[:, :, lo:lo + D]                               # [tb, tk, D]
        v_h = v_full[:, :, lo:lo + D]                               # [tb, tk, D]

        s = jnp.einsum('bqd,bkd->bqk', q_h, k_h,
                       preferred_element_type=jnp.float32)          # [tb, tq, tk] f32
        s = s + (b_ref[h].astype(jnp.float32) + mask_bias)[None]    # pair bias + mask

        m_prev = m_scr[h]                                           # [tb, tq, 1]
        m_new = jnp.maximum(m_prev, jnp.max(s, axis=-1, keepdims=True))
        alpha = jnp.exp(m_prev - m_new)
        p = jnp.exp(s - m_new)                                      # [tb, tq, tk]
        l_scr[h] = alpha * l_scr[h] + jnp.sum(p, axis=-1, keepdims=True)
        acc_scr[h] = alpha * acc_scr[h] + jnp.einsum(
            'bqk,bkd->bqd', p.astype(v_h.dtype), v_h,
            preferred_element_type=jnp.float32)
        m_scr[h] = m_new

    @pl.when(ki == nk - 1)
    def _():
        outs = []
        for h in range(H):
            inv_l = pl.reciprocal(l_scr[h], approx=True)            # EUP, frees VALU
            outs.append(acc_scr[h] * inv_l)                         # [tb, tq, D]
        # single lane-dense [tb, tq, H*D] store
        o_ref[...] = jnp.concatenate(outs, axis=-1).astype(o_ref.dtype)


def flash_biased_attention(q, k, v, bias, mask_bias, *, q_tile=256, kv_tile=256, b_tile=4):
    # q, k, v: [B, S, H*D] bf16; bias: [H, S, S] bf16; mask_bias: [S, S] bf16 (additive)
    B, S, HD = q.shape
    H = bias.shape[0]
    D = HD // H
    tb = _choose_tile(B, b_tile, 1)      # amortize bias/mask DMA over tb MSA rows
    tq = _choose_tile(S, q_tile, 8)
    tk = _choose_tile(S, kv_tile, 128)
    grid = (B // tb, S // tq, S // tk)
    return pl.pallas_call(
        partial(_flash_attn_kernel, num_heads=H, head_dim=D),
        out_shape=jax.ShapeDtypeStruct((B, S, HD), jnp.bfloat16),
        grid=grid,
        in_specs=[
            pl.BlockSpec((tb, tq, HD), lambda b, qi, ki: (b, qi, 0)),
            pl.BlockSpec((tb, tk, HD), lambda b, qi, ki: (b, ki, 0)),
            pl.BlockSpec((tb, tk, HD), lambda b, qi, ki: (b, ki, 0)),
            pl.BlockSpec((H, tq, tk), lambda b, qi, ki: (0, qi, ki)),
            pl.BlockSpec((tq, tk), lambda b, qi, ki: (qi, ki)),
        ],
        out_specs=pl.BlockSpec((tb, tq, HD), lambda b, qi, ki: (b, qi, 0)),
        scratch_shapes=[
            pltpu.VMEM((H, tb, tq, D), q.dtype),      # cached per-head q slices
            pltpu.VMEM((H, tb, tq, 1), jnp.float32),  # running max
            pltpu.VMEM((H, tb, tq, 1), jnp.float32),  # running sum
            pltpu.VMEM((H, tb, tq, D), jnp.float32),  # output accumulator
        ],
        compiler_params=pltpu.CompilerParams(
            dimension_semantics=("parallel", "parallel", "arbitrary"),
            vmem_limit_bytes=48 * 1024 * 1024),       # safe on v7x (64 MiB) and v5e/v6e
    )(q, k, v, bias, mask_bias)


# ---------------- fused output projection + gating ----------------
def _out_gate_kernel(a_ref, g_ref, wo_ref, bo_ref, o_ref):
    o = jnp.dot(a_ref[...], wo_ref[...],
                preferred_element_type=jnp.float32) + bo_ref[...]
    o_ref[...] = (o * g_ref[...].astype(jnp.float32)).astype(o_ref.dtype)


def out_gate(attn, g, wo, bo, row_tile=512):
    N, C = attn.shape
    tm = _choose_tile(N, row_tile, 8)
    row_spec = lambda i: (i, 0)
    return pl.pallas_call(
        _out_gate_kernel,
        out_shape=jax.ShapeDtypeStruct((N, C), jnp.float32),
        grid=(N // tm,),
        in_specs=[pl.BlockSpec((tm, C), row_spec),
                  pl.BlockSpec((tm, C), row_spec),
                  pl.BlockSpec((C, C), lambda i: (0, 0)),
                  pl.BlockSpec((1, C), lambda i: (0, 0))],
        out_specs=pl.BlockSpec((tm, C), row_spec),
        compiler_params=pltpu.CompilerParams(dimension_semantics=("parallel",)),
    )(attn, g, wo, bo)


# ---------------- parameters (PyTorch Linear layout: [out_features, in_features]) ----------------
def init_params(key, c_m, c_z):
    H, D = c_m // 32, 32
    ks = jax.random.split(key, 10)
    w = lambda k, shape, s=0.02: s * jax.random.normal(k, shape, dtype=jnp.float32)
    return {
        "norm_m_w": 1.0 + w(ks[0], (c_m,)),
        "norm_z_w": 1.0 + w(ks[1], (c_z,)),
        "linear_z_w": w(ks[2], (H, c_z)),
        "linear_q_w": w(ks[3], (H * D, c_m)),
        "linear_k_w": w(ks[4], (H * D, c_m)),
        "linear_v_w": w(ks[5], (H * D, c_m)),
        "linear_g_w": w(ks[6], (c_m, c_m)),
        "linear_g_b": w(ks[7], (c_m,)),
        "linear_o_w": w(ks[8], (c_m, c_m)),
        "linear_o_b": w(ks[9], (c_m,)),
    }


def prepare_params(params, c_m):
    """One-time weight prep: transpose to [in,out], concat QKV+gate, fold 1/sqrt(D) into Q,
    and pre-cast all matmul weights to bf16 (f32 biases / norm weights stay f32)."""
    D = 32
    H = c_m // D
    scale = 1.0 / math.sqrt(D)
    wq = params["linear_q_w"].T * scale                 # SDPA scale folded into Q columns
    wk = params["linear_k_w"].T
    wv = params["linear_v_w"].T
    wg = params["linear_g_w"].T
    w_qkvg = jnp.concatenate([wq, wk, wv, wg], axis=1).astype(jnp.bfloat16)   # [c_m, 3*H*D + c_m]
    b_qkvg = jnp.concatenate(
        [jnp.zeros((3 * H * D,), jnp.float32), params["linear_g_b"]]).reshape(1, -1)
    return {
        "norm_m_w": params["norm_m_w"].reshape(1, c_m),
        "norm_z_w": params["norm_z_w"].reshape(1, -1),
        "w_qkvg": w_qkvg,
        "b_qkvg": b_qkvg,
        "w_z": params["linear_z_w"].astype(jnp.bfloat16),      # [H, c_z]
        "w_o": params["linear_o_w"].T.astype(jnp.bfloat16),    # [c_m, c_m]
        "b_o": params["linear_o_b"].reshape(1, c_m),
    }


# ---------------- module forward (Pallas kernels; no HBM transposes) ----------------
def msa_row_attention_with_pair_bias(m, z, z_mask, kparams, inf=1e9, eps=1e-5):
    B, S, c_m = m.shape
    D = 32
    H = c_m // D
    HD = H * D                       # == c_m
    assert c_m % 32 == 0
    c_z = kparams["w_z"].shape[1]

    # Pad S to a multiple of 128 so every tile is lane-aligned (no full-dim
    # fallback blocks that could blow VMEM for ragged S).  Padded keys are
    # masked out; padded query rows are sliced off at the end.
    S_pad = ((S + 127) // 128) * 128
    if S_pad != S:
        p = S_pad - S
        m = jnp.pad(m, ((0, 0), (0, p), (0, 0)))
        z = jnp.pad(z, ((0, p), (0, p), (0, 0)))
        z_mask = jnp.pad(z_mask, ((0, p), (0, p)))
    N = B * S_pad

    # RMSNorm(m) + Q/K/V/gate in one pass over m (q already scaled by 1/sqrt(D)); bf16 outputs.
    q2, k2, v2, g2 = fused_norm_qkvg(m.reshape(N, c_m), kparams["norm_m_w"],
                                     kparams["w_qkvg"], kparams["b_qkvg"], HD, eps)
    q = q2.reshape(B, S_pad, HD)     # free reshapes (leading-dim split only)
    k = k2.reshape(B, S_pad, HD)
    v = v2.reshape(B, S_pad, HD)

    # RMSNorm(z) + per-head pair bias on the MXU; [H, S*S] slab -> free reinterpret as [H, S, S].
    bias = pair_bias(z.reshape(S_pad * S_pad, c_z), kparams["norm_z_w"],
                     kparams["w_z"], eps).reshape(H, S_pad, S_pad)

    # Additive mask bias, stored once in bf16 (never duplicated H times in HBM).
    mask_bias = jnp.where(z_mask > 0.5, 0.0, -inf).astype(jnp.bfloat16)

    # Row-batched flash attention over all heads.
    attn = flash_biased_attention(q, k, v, bias, mask_bias)          # [B, S_pad, H*D] bf16

    # Output projection + gating (gate is a plain Linear, matching the PyTorch spec).
    o = out_gate(attn.reshape(N, c_m), g2, kparams["w_o"], kparams["b_o"])
    o = o.reshape(B, S_pad, c_m)
    if S_pad != S:
        o = o[:, :S, :]
    return o.astype(jnp.float32)


# ---------------- pure-JAX reference for validation ----------------
def reference(m, z, z_mask, params, inf=1e9, eps=1e-5):
    B, S, c_m = m.shape
    D = 32
    H = c_m // D

    def rms(x, w):
        return x * lax.rsqrt(jnp.mean(x * x, -1, keepdims=True) + eps) * w

    mn = rms(m, params["norm_m_w"])
    zn = rms(z, params["norm_z_w"])
    q = (mn @ params["linear_q_w"].T).reshape(B, S, H, D).transpose(0, 2, 1, 3)
    k = (mn @ params["linear_k_w"].T).reshape(B, S, H, D).transpose(0, 2, 1, 3)
    v = (mn @ params["linear_v_w"].T).reshape(B, S, H, D).transpose(0, 2, 1, 3)
    g = mn @ params["linear_g_w"].T + params["linear_g_b"]
    zb = (zn @ params["linear_z_w"].T).transpose(2, 0, 1)            # [H, S, S]
    bias = zb[None] + jnp.where(z_mask > 0.5, 0.0, -inf)[None, None]
    s = jnp.einsum("bhqd,bhkd->bhqk", q, k) / math.sqrt(D) + bias
    p = jax.nn.softmax(s, axis=-1)
    a = jnp.einsum("bhqk,bhkd->bhqd", p, v).transpose(0, 2, 1, 3).reshape(B, S, c_m)
    o = (a @ params["linear_o_w"].T + params["linear_o_b"]) * g
    return o.astype(jnp.float32)


if __name__ == "__main__":
    key = jax.random.PRNGKey(0)
    B, S, c_m, c_z = 2, 8, 64, 16    # H = 2 heads, D = 32
    inf, eps = 1e9, 1e-5

    k1, k2, k3, kp = jax.random.split(key, 4)
    m = jax.random.normal(k1, (B, S, c_m), dtype=jnp.float32)
    z = jax.random.normal(k2, (S, S, c_z), dtype=jnp.float32)
    z_mask = (jax.random.uniform(k3, (S, S)) > 0.2).astype(jnp.float32)
    z_mask = z_mask.at[:, 0].set(1.0)    # avoid fully-masked rows
    params = init_params(kp, c_m, c_z)
    kparams = prepare_params(params, c_m)

    out = msa_row_attention_with_pair_bias(m, z, z_mask, kparams, inf, eps)
    out = jax.block_until_ready(out)

    ref = reference(m, z, z_mask, params, inf, eps)
    assert out.shape == (B, S, c_m) and out.dtype == jnp.float32
    assert bool(jnp.all(jnp.isfinite(out)))
    err = float(jnp.max(jnp.abs(out - ref)))
    assert bool(jnp.allclose(out, ref, rtol=5e-2, atol=5e-2)), err
    print("KERNEL_OK")
</pallas_src>

<mosaic_0001>
module attributes {stable_mosaic.version = 11 : i64} {
  func.func @_norm_proj_kernel(%arg0: i32, %arg1: memref<256x64xf32, #tpu.memory_space<vmem>>, %arg2: memref<1x64xf32, #tpu.memory_space<vmem>>, %arg3: memref<64x256xbf16, #tpu.memory_space<vmem>>, %arg4: memref<1x256xf32, #tpu.memory_space<vmem>>, %arg5: memref<256x64xbf16, #tpu.memory_space<vmem>>, %arg6: memref<256x64xbf16, #tpu.memory_space<vmem>>, %arg7: memref<256x64xbf16, #tpu.memory_space<vmem>>, %arg8: memref<256x64xbf16, #tpu.memory_space<vmem>>) attributes {dimension_semantics = [#tpu.dimension_semantics<parallel>], iteration_bounds = array<i64: 1>, scalar_prefetch = 0 : i64, scratch_operands = 0 : i64, tpu.core_type = #tpu.core_type<tc>, window_params = [{transform_indices = @transform_0, window_bounds = array<i64: 256, 64>}, {pipeline_mode = #tpu.pipeline_mode<synchronous>, transform_indices = @transform_1, window_bounds = array<i64: 1, 64>}, {pipeline_mode = #tpu.pipeline_mode<synchronous>, transform_indices = @transform_2, window_bounds = array<i64: 64, 256>}, {pipeline_mode = #tpu.pipeline_mode<synchronous>, transform_indices = @transform_3, window_bounds = array<i64: 1, 256>}, {transform_indices = @transform_4, window_bounds = array<i64: 256, 64>}, {transform_indices = @transform_5, window_bounds = array<i64: 256, 64>}, {transform_indices = @transform_6, window_bounds = array<i64: 256, 64>}, {transform_indices = @transform_7, window_bounds = array<i64: 256, 64>}]} {
    %c0 = arith.constant 0 : index
    %c0_0 = arith.constant 0 : index
    %0 = vector.load %arg1[%c0, %c0_0] : memref<256x64xf32, #tpu.memory_space<vmem>>, vector<256x64xf32>
    %1 = arith.mulf %0, %0 : vector<256x64xf32>
    %cst = arith.constant dense<0.000000e+00> : vector<256xf32>
    %2 = vector.multi_reduction <add>, %1, %cst [1] : vector<256x64xf32> to vector<256xf32>
    %3 = vector.shape_cast %2 : vector<256xf32> to vector<256x1xf32>
    %cst_1 = arith.constant 6.400000e+01 : f32
    %4 = vector.broadcast %cst_1 : f32 to vector<256x1xf32>
    %5 = arith.divf %3, %4 : vector<256x1xf32>
    %cst_2 = arith.constant 9.99999974E-6 : f32
    %6 = vector.broadcast %cst_2 : f32 to vector<256x1xf32>
    %7 = arith.addf %5, %6 : vector<256x1xf32>
    %8 = math.rsqrt %7 : vector<256x1xf32>
    %9 = vector.broadcast %8 : vector<256x1xf32> to vector<256x64xf32>
    %10 = arith.mulf %0, %9 : vector<256x64xf32>
    %c0_3 = arith.constant 0 : index
    %c0_4 = arith.constant 0 : index
    %11 = vector.load %arg2[%c0_3, %c0_4] : memref<1x64xf32, #tpu.memory_space<vmem>>, vector<1x64xf32>
    %12 = vector.broadcast %11 : vector<1x64xf32> to vector<256x64xf32>
    %13 = arith.mulf %10, %12 : vector<256x64xf32>
    %14 = arith.truncf %13 : vector<256x64xf32> to vector<256x64xbf16>
    %c0_5 = arith.constant 0 : index
    %c0_6 = arith.constant 0 : index
    %15 = vector.load %arg3[%c0_5, %c0_6] : memref<64x256xbf16, #tpu.memory_space<vmem>>, vector<64x256xbf16>
    %cst_7 = arith.constant dense<0.000000e+00> : vector<256x256xf32>
    %16 = tpu.matmul %14, %15, %cst_7 {dimension_numbers = #tpu.dot_dimension_numbers<[1], [0], [0], [1], [0, 0, 1, 1], [], []>} : vector<256x64xbf16>, vector<64x256xbf16>, vector<256x256xf32> -> vector<256x256xf32>
    %c0_8 = arith.constant 0 : index
    %c0_9 = arith.constant 0 : index
    %17 = vector.load %arg4[%c0_8, %c0_9] : memref<1x256xf32, #tpu.memory_space<vmem>>, vector<1x256xf32>
    %18 = vector.broadcast %17 : vector<1x256xf32> to vector<256x256xf32>
    %19 = arith.addf %16, %18 : vector<256x256xf32>
    %20 = vector.extract_strided_slice %19 {offsets = [0, 0], sizes = [256, 64], strides = [1, 1]} : vector<256x256xf32> to vector<256x64xf32>
    %21 = arith.truncf %20 : vector<256x64xf32> to vector<256x64xbf16>
    %c0_10 = arith.constant 0 : index
    %c0_11 = arith.constant 0 : index
    %22 = vector.load %arg5[%c0_10, %c0_11] : memref<256x64xbf16, #tpu.memory_space<vmem>>, vector<256x64xbf16>
    tpu.vector_store %arg5[%c0_10, %c0_11], %21 {strides = array<i32>} : memref<256x64xbf16, #tpu.memory_space<vmem>>, vector<256x64xbf16>,
    %23 = vector.extract_strided_slice %19 {offsets = [0, 64], sizes = [256, 64], strides = [1, 1]} : vector<256x256xf32> to vector<256x64xf32>
    %24 = arith.truncf %23 : vector<256x64xf32> to vector<256x64xbf16>
    %c0_12 = arith.constant 0 : index
    %c0_13 = arith.constant 0 : index
    %25 = vector.load %arg6[%c0_12, %c0_13] : memref<256x64xbf16, #tpu.memory_space<vmem>>, vector<256x64xbf16>
    tpu.vector_store %arg6[%c0_12, %c0_13], %24 {strides = array<i32>} : memref<256x64xbf16, #tpu.memory_space<vmem>>, vector<256x64xbf16>,
    %26 = vector.extract_strided_slice %19 {offsets = [0, 128], sizes = [256, 64], strides = [1, 1]} : vector<256x256xf32> to vector<256x64xf32>
    %27 = arith.truncf %26 : vector<256x64xf32> to vector<256x64xbf16>
    %c0_14 = arith.constant 0 : index
    %c0_15 = arith.constant 0 : index
    %28 = vector.load %arg7[%c0_14, %c0_15] : memref<256x64xbf16, #tpu.memory_space<vmem>>, vector<256x64xbf16>
    tpu.vector_store %arg7[%c0_14, %c0_15], %27 {strides = array<i32>} : memref<256x64xbf16, #tpu.memory_space<vmem>>, vector<256x64xbf16>,
    %29 = vector.extract_strided_slice %19 {offsets = [0, 192], sizes = [256, 64], strides = [1, 1]} : vector<256x256xf32> to vector<256x64xf32>
    %30 = arith.truncf %29 : vector<256x64xf32> to vector<256x64xbf16>
    %c0_16 = arith.constant 0 : index
    %c0_17 = arith.constant 0 : index
    %31 = vector.load %arg8[%c0_16, %c0_17] : memref<256x64xbf16, #tpu.memory_space<vmem>>, vector<256x64xbf16>
    tpu.vector_store %arg8[%c0_16, %c0_17], %30 {strides = array<i32>} : memref<256x64xbf16, #tpu.memory_space<vmem>>, vector<256x64xbf16>,
    return
  }
  func.func @transform_0(%arg0: i32) -> (i32, i32) {
    %c0_i32 = arith.constant 0 : i32
    %c0_i32_0 = arith.constant 0 : i32
    return %arg0, %c0_i32 : i32, i32
  }
  func.func @transform_1(%arg0: i32) -> (i32, i32) {
    %c0_i32 = arith.constant 0 : i32
    %c0_i32_0 = arith.constant 0 : i32
    %c0_i32_1 = arith.constant 0 : i32
    return %c0_i32, %c0_i32_0 : i32, i32
  }
  func.func @transform_2(%arg0: i32) -> (i32, i32) {
    %c0_i32 = arith.constant 0 : i32
    %c0_i32_0 = arith.constant 0 : i32
    %c0_i32_1 = arith.constant 0 : i32
    return %c0_i32, %c0_i32_0 : i32, i32
  }
  func.func @transform_3(%arg0: i32) -> (i32, i32) {
    %c0_i32 = arith.constant 0 : i32
    %c0_i32_0 = arith.constant 0 : i32
    %c0_i32_1 = arith.constant 0 : i32
    return %c0_i32, %c0_i32_0 : i32, i32
  }
  func.func @transform_4(%arg0: i32) -> (i32, i32) {
    %c0_i32 = arith.constant 0 : i32
    %c0_i32_0 = arith.constant 0 : i32
    return %arg0, %c0_i32 : i32, i32
  }
  func.func @transform_5(%arg0: i32) -> (i32, i32) {
    %c0_i32 = arith.constant 0 : i32
    %c0_i32_0 = arith.constant 0 : i32
    return %arg0, %c0_i32 : i32, i32
  }
  func.func @transform_6(%arg0: i32) -> (i32, i32) {
    %c0_i32 = arith.constant 0 : i32
    %c0_i32_0 = arith.constant 0 : i32
    return %arg0, %c0_i32 : i32, i32
  }
  func.func @transform_7(%arg0: i32) -> (i32, i32) {
    %c0_i32 = arith.constant 0 : i32
    %c0_i32_0 = arith.constant 0 : i32
    return %arg0, %c0_i32 : i32, i32
  }
}

</mosaic_0001>

<bundles_post_ra>
// kernel: tpu_custom_call.1
= control target key start
LH: loop header
LB: loop body
LE: loop exit
PB: predicated region body
PF: predicated region fallthrough
CT: control target
= control target key end

     0   :  { %vm86_vm0 = vcmask 523264   ;;  %vm796_vm1 = vcmask 519168   ;;  %s1501_s18 = smov 64   ;;  %s2742_s0 = inlined_call_operand.vmem [shape: f32[256,64], index: 0, kind: input, shape index: {}]   ;;  %s2743_s2 = inlined_call_operand.vmem [shape: bf16[64,256], index: 2, kind: input, shape index: {}]   ;;  %s2744_s1 = inlined_call_operand.vmem [shape: f32[1,64], index: 1, kind: input, shape index: {}]   ;;  %s2745_s3 = inlined_call_operand.vmem [shape: f32[1,256], index: 3, kind: input, shape index: {}]   ;;  %s2746_s4 = inlined_call_operand.vmem [shape: bf16[256,64], index: 4, kind: output, shape index: {0}]   ;;  %s2747_s6 = inlined_call_operand.vmem [shape: bf16[256,64], index: 6, kind: output, shape index: {2}]   ;;  %s2748_s5 = inlined_call_operand.vmem [shape: bf16[256,64], index: 5, kind: output, shape index: {1}]   ;;  %s2749_s7 = inlined_call_operand.vmem [shape: bf16[256,64], index: 7, kind: output, shape index: {3}]  }
   0x1   :  { %v1545_v0 = vld [vmem:[%s2742_s0 + $0x80] sm:$0xff]  ;;  %v1555_v2 = vld [vmem:[%s2742_s0 + $0x88] sm:$0xff]  ;;  %v1573_v8 = vld [vmem:[%s2742_s0 + $0x18] sm:$0xff] }
   0x2   :  { %v1550_v1 = vld [vmem:[%s2742_s0] sm:$0xff]  ;;  %v70_v3 = vmul.f32 %v1545_v0, %v1545_v0  ;;  %v71_v5 = vmul.f32 %v1555_v2, %v1555_v2  ;;  %v1566_v6 = vld [vmem:[%s2742_s0 + $0x8] sm:$0xff]  ;;  %v1578_v9 = vld [vmem:[%s2742_s0 + $0x10] sm:$0xff]  ;;  %v57_v14 = vmul.f32 %v1573_v8, %v1573_v8 }
   0x3   :  { %v54_v4 = vmul.f32 %v1550_v1, %v1550_v1  ;;  %v55_v7 = vmul.f32 %v1566_v6, %v1566_v6  ;;  %v56_v15 = vmul.f32 %v1578_v9, %v1578_v9  ;;  %v1591_v16 = vld [vmem:[%s2742_s0 + $0x98] sm:$0xff]  ;;  %v1596_v17 = vld [vmem:[%s2742_s0 + $0x90] sm:$0xff]  ;;  %v1607_v22 = vld [vmem:[%s2742_s0 + $0x28] sm:$0xff] }
   0x4   :  { %v135_v10 = vsel %vm86_vm0, %v70_v3, 0.0  ;;  %v138_v12 = vsel %vm86_vm0, %v71_v5, 0.0  ;;  %v96_v18 = vsel %vm86_vm0, %v57_v14, 0.0  ;;  %v73_v20 = vmul.f32 %v1591_v16, %v1591_v16  ;;  %v1612_v23 = vld [vmem:[%s2742_s0 + $0x20] sm:$0xff]  ;;  %v1623_v28 = vld [vmem:[%s2742_s0 + $0xa8] sm:$0xff]  ;;  %v1639_v34 = vld [vmem:[%s2742_s0 + $0x38] sm:$0xff] }
   0x5   :  { %v87_v11 = vsel %vm86_vm0, %v54_v4, 0.0  ;;  %136 = vadd.xlane.f32.xlu1 %v135_v10  ;;  %v90_v13 = vsel %vm86_vm0, %v55_v7, 0.0  ;;  %v93_v19 = vsel %vm86_vm0, %v56_v15, 0.0  ;;  %v72_v21 = vmul.f32 %v1596_v17, %v1596_v17  ;;  %v1628_v29 = vld [vmem:[%s2742_s0 + $0xa0] sm:$0xff]  ;;  %v1644_v35 = vld [vmem:[%s2742_s0 + $0x30] sm:$0xff]  ;;  %v1655_v40 = vld [vmem:[%s2742_s0 + $0xb8] sm:$0xff] }
   0x6   :  { %88 = vadd.xlane.f32.xlu0 %v87_v11  ;;  %v144_v24 = vsel %vm86_vm0, %v73_v20, 0.0  ;;  %v59_v26 = vmul.f32 %v1607_v22, %v1607_v22  ;;  %v58_v27 = vmul.f32 %v1612_v23, %v1612_v23  ;;  %v75_v32 = vmul.f32 %v1623_v28, %v1623_v28  ;;  %v1660_v41 = vld [vmem:[%s2742_s0 + $0xb0] sm:$0xff]  ;;  %v1671_v46 = vld [vmem:[%s2742_s0 + $0x48] sm:$0xff]  ;;  %v1676_v47 = vld [vmem:[%s2742_s0 + $0x40] sm:$0xff] }
   0x7   :  { %v141_v25 = vsel %vm86_vm0, %v72_v21, 0.0  ;;  %v74_v33 = vmul.f32 %v1628_v29, %v1628_v29  ;;  %v61_v38 = vmul.f32 %v1639_v34, %v1639_v34  ;;  %v60_v39 = vmul.f32 %v1644_v35, %v1644_v35  ;;  %v1424_v48 = vld [vmem:[%s2743_s2 + $0x4] ss:$8 sps:$4 sm:$0xff]   ;;  %v1426_v49 = vld [vmem:[%s2743_s2] ss:$8 sps:$4 sm:$0xff]   ;;  %v1718_v63 = vld [vmem:[%s2742_s0 + $0x58] sm:$0xff] }
   0x8   :  { %v102_v30 = vsel %vm86_vm0, %v59_v26, 0.0  ;;  %v99_v31 = vsel %vm86_vm0, %v58_v27, 0.0  ;;  %v150_v36 = vsel %vm86_vm0, %v75_v32, 0.0  ;;  %v77_v44 = vmul.f32 %v1655_v40, %v1655_v40  ;;  %v1427_v50 = vld [vmem:[%s2743_s2 + $0x14] ss:$8 sps:$4 sm:$0xff]   ;;  %475 = vmatprep.subr.bf16.mxu0 %v1424_v48  ;;  %1414 = vmatprep.subr.bf16.mxu1 %v1424_v48  ;;  %v1696_v55 = vld [vmem:[%s2742_s0 + $0xc8] sm:$0xff] }
   0x9   :  { %139 = vadd.xlane.f32.xlu1 %v138_v12  ;;  %v147_v37 = vsel %vm86_vm0, %v74_v33, 0.0  ;;  %v108_v42 = vsel %vm86_vm0, %v61_v38, 0.0  ;;  %v105_v43 = vsel %vm86_vm0, %v60_v39, 0.0  ;;  %v76_v45 = vmul.f32 %v1660_v41, %v1660_v41  ;;  %v1701_v56 = vld [vmem:[%s2742_s0 + $0xc0] sm:$0xff]  ;;  %476 = vmatpush1.bf16.msra.mxu0 %v1426_v49  ;;  %v1429_v57 = vld [vmem:[%s2743_s2 + $0x10] ss:$8 sps:$4 sm:$0xff]  }
   0xa   :  { %91 = vadd.xlane.f32.xlu0 %v90_v13  ;;  %v156_v51 = vsel %vm86_vm0, %v77_v44, 0.0  ;;  %v63_v53 = vmul.f32 %v1671_v46, %v1671_v46  ;;  %v62_v54 = vmul.f32 %v1676_v47, %v1676_v47  ;;  %1418 = vmatpush1.bf16.msra.mxu1 %v1426_v49  ;;  %v1430_v58 = vld [vmem:[%s2743_s2 + $0x24] ss:$8 sps:$4 sm:$0xff]   ;;  %v79_v61 = vmul.f32 %v1696_v55, %v1696_v55  ;;  %v1723_v3 = vld [vmem:[%s2742_s0 + $0x50] sm:$0xff]  ;;  %v1432_v4 = vld [vmem:[%s2743_s2 + $0x20] ss:$8 sps:$4 sm:$0xff]  }
   0xb   :  { %v153_v52 = vsel %vm86_vm0, %v76_v45, 0.0  ;;  %477 = vmatprep.subr.bf16.mxu0 %v1427_v50  ;;  %1415 = vmatprep.subr.bf16.mxu1 %v1427_v50  ;;  %v78_v62 = vmul.f32 %v1701_v56, %v1701_v56  ;;  %v1433_v5 = vld [vmem:[%s2743_s2 + $0x34] ss:$8 sps:$4 sm:$0xff]   ;;  %v65_v11 = vmul.f32 %v1718_v63, %v1718_v63  ;;  %v64_v12 = vmul.f32 %v1723_v3, %v1723_v3  ;;  %v1766_v26 = vld [vmem:[%s2742_s0 + $0x60] sm:$0xff]  ;;  %v1777_v33 = vld [vmem:[%s2742_s0 + $0xe8] sm:$0xff] }
   0xc   :  { %v114_v59 = vsel %vm86_vm0, %v63_v53, 0.0  ;;  %v111_v60 = vsel %vm86_vm0, %v62_v54, 0.0  ;;  %v162_v7 = vsel %vm86_vm0, %v79_v61, 0.0  ;;  %v1500_v13 = vmov 0   ;;  %v1742_v14 = vld [vmem:[%s2742_s0 + $0xd8] sm:$0xff]  ;;  %v1747_v15 = vld [vmem:[%s2742_s0 + $0xd0] sm:$0xff] }
   0xd   :  { %97 = vadd.xlane.f32.xlu1 %v96_v18  ;;  %478 = vmatpush1.bf16.msra.mxu0 %v1429_v57  ;;  %v159_v10 = vsel %vm86_vm0, %v78_v62, 0.0  ;;  %v1435_v18 = vld [vmem:[%s2743_s2 + $0x30] ss:$8 sps:$4 sm:$0xff]   ;;  %v117_v20 = vsel %vm86_vm0, %v64_v12, 0.0  ;;  %v81_v21 = vmul.f32 %v1742_v14, %v1742_v14  ;;  %v66_v32 = vmul.f32 %v1766_v26, %v1766_v26 }
   0xe   :  { %94 = vadd.xlane.f32.xlu0 %v93_v19  ;;  %1419 = vmatpush1.bf16.msra.mxu1 %v1429_v57  ;;  %v120_v19 = vsel %vm86_vm0, %v65_v11, 0.0  ;;  %v83_v39 = vmul.f32 %v1777_v33, %v1777_v33  ;;  %v1798_v44 = vld [vmem:[%s2742_s0 + $0x70] sm:$0xff] }
   0xf   :  { %479 = vmatprep.subr.bf16.mxu0 %v1430_v58  ;;  %1416 = vmatprep.subr.bf16.mxu1 %v1430_v58  ;;  %v168_v27 = vsel %vm86_vm0, %v81_v21, 0.0  ;;  %v123_v38 = vsel %vm86_vm0, %v66_v32, 0.0  ;;  %v68_v50 = vmul.f32 %v1798_v44, %v1798_v44 }
  0x10   :  { %507 = vmatprep.mubr.bf16.mxu0 %v1500_v13  ;;  %587 = vmatprep.mubr.bf16.mxu1 %v1500_v13  ;;  %v174_v45 = vsel %vm86_vm0, %v83_v39, 0.0 }
  0x11   :  { %145 = vadd.xlane.f32.xlu1 %v144_v24  ;;  %480 = vmatpush1.bf16.msra.mxu0 %v1432_v4  ;;  %v80_v24 = vmul.f32 %v1747_v15, %v1747_v15  ;;  %v129_v54 = vsel %vm86_vm0, %v68_v50, 0.0 }
  0x12   :  { %142 = vadd.xlane.f32.xlu0 %v141_v25  ;;  %1420 = vmatpush1.bf16.msra.mxu1 %v1432_v4  ;;  %v1761_v25 = vld [vmem:[%s2742_s0 + $0x68] sm:$0xff] }
  0x13   :  { %481 = vmatprep.subr.bf16.mxu0 %v1433_v5  ;;  %1417 = vmatprep.subr.bf16.mxu1 %v1433_v5 }
  0x15   :  { %103 = vadd.xlane.f32.xlu1 %v102_v30  ;;  %482 = vmatpush1.bf16.msra.mxu0 %v1435_v18  ;;  %v165_v30 = vsel %vm86_vm0, %v80_v24, 0.0 }
  0x16   :  { %100 = vadd.xlane.f32.xlu0 %v99_v31  ;;  %1421 = vmatpush1.bf16.msra.mxu1 %v1435_v18  ;;  %v67_v31 = vmul.f32 %v1761_v25, %v1761_v25 }
  0x19   :  { %151 = vadd.xlane.f32.xlu1 %v150_v36  ;;  %v1782_v36 = vld [vmem:[%s2742_s0 + $0xe0] sm:$0xff] }
  0x1a   :  { %148 = vadd.xlane.f32.xlu0 %v147_v37  ;;  %v126_v37 = vsel %vm86_vm0, %v67_v31, 0.0 }
  0x1d   :  { %109 = vadd.xlane.f32.xlu1 %v108_v42  ;;  %v82_v42 = vmul.f32 %v1782_v36, %v1782_v36 }
  0x1e   :  { %106 = vadd.xlane.f32.xlu0 %v105_v43  ;;  %v1793_v43 = vld [vmem:[%s2742_s0 + $0x78] sm:$0xff] }
  0x1f   :  { %v171_v48 = vsel %vm86_vm0, %v82_v42, 0.0  ;;  %v69_v49 = vmul.f32 %v1793_v43, %v1793_v43 }
  0x21   :  { %157 = vadd.xlane.f32.xlu1 %v156_v51  ;;  %v1809_v51 = vld [vmem:[%s2742_s0 + $0xf8] sm:$0xff]  ;;  %v132_v53 = vsel %vm86_vm0, %v69_v49, 0.0 }
  0x22   :  { %154 = vadd.xlane.f32.xlu0 %v153_v52  ;;  %v1814_v52 = vld [vmem:[%s2742_s0 + $0xf0] sm:$0xff]  ;;  %v85_v57 = vmul.f32 %v1809_v51, %v1809_v51 }
  0x23   :  { %v84_v58 = vmul.f32 %v1814_v52, %v1814_v52 }
  0x25   :  { %115 = vadd.xlane.f32.xlu1 %v114_v59  ;;  %v180_v59 = vsel %vm86_vm0, %v85_v57, 0.0 }
  0x26   :  { %112 = vadd.xlane.f32.xlu0 %v111_v60  ;;  %v177_v60 = vsel %vm86_vm0, %v84_v58, 0.0 }
  0x29   :  { %163 = vadd.xlane.f32.xlu1 %v162_v7 }
  0x2a   :  { %160 = vadd.xlane.f32.xlu0 %v159_v10 }
  0x2d   :  { %121 = vadd.xlane.f32.xlu1 %v120_v19 }
  0x2e   :  { %118 = vadd.xlane.f32.xlu0 %v117_v20 }
  0x31   :  { %169 = vadd.xlane.f32.xlu1 %v168_v27 }
  0x32   :  { %166 = vadd.xlane.f32.xlu0 %v165_v30 }
  0x35   :  { %127 = vadd.xlane.f32.xlu1 %v126_v37 }
  0x36   :  { %124 = vadd.xlane.f32.xlu0 %v123_v38 }
  0x39   :  { %175 = vadd.xlane.f32.xlu1 %v174_v45 }
  0x3a   :  { %172 = vadd.xlane.f32.xlu0 %v171_v48 }
  0x3d   :  { %133 = vadd.xlane.f32.xlu1 %v132_v53 }
  0x3e   :  { %130 = vadd.xlane.f32.xlu0 %v129_v54 }
  0x41   :  { %181 = vadd.xlane.f32.xlu1 %v180_v59 }
  0x42   :  { %178 = vadd.xlane.f32.xlu0 %v177_v60 }
  0x92   :  { %v137_v61 = vpop.xlane.xlu1 %136 }
  0x93   :  { %v89_v62 = vpop.xlane.xlu0 %88  ;;  %v200_v4 = vmul.f32 0.015625, %v137_v61 }
  0x94   :  { %v184_v5 = vmul.f32 0.015625, %v89_v62 }
  0x95   :  { %v232_v7 = vadd.f32 1e-05, %v200_v4  ;;  %v1829_v4 = vld [vmem:[%s2744_s1] ss:$0 sm:$0xff] }
  0x96   :  { %v216_v10 = vadd.f32 1e-05, %v184_v5  ;;  %v140_v11 = vpop.xlane.xlu1 %139 }
  0x97   :  { %v92_v12 = vpop.xlane.xlu0 %91  ;;  %1436 = vrsqrt.f32 %v232_v7  ;;  %v201_v18 = vmul.f32 0.015625, %v140_v11 }
  0x98   :  { %v185_v19 = vmul.f32 0.015625, %v92_v12  ;;  %1438 = vrsqrt.f32 %v216_v10 }
  0x99   :  { %v233_v20 = vadd.f32 1e-05, %v201_v18 }
  0x9a   :  { %v217_v21 = vadd.f32 1e-05, %v185_v19  ;;  %v98_v24 = vpop.xlane.xlu1 %97 }
  0x9b   :  { %v95_v27 = vpop.xlane.xlu0 %94  ;;  %1440 = vrsqrt.f32 %v233_v20  ;;  %v187_v30 = vmul.f32 0.015625, %v98_v24 }
  0x9c   :  { %v186_v31 = vmul.f32 0.015625, %v95_v27  ;;  %1442 = vrsqrt.f32 %v217_v21 }
  0x9d   :  { %v219_v32 = vadd.f32 1e-05, %v187_v30 }
  0x9e   :  { %v218_v37 = vadd.f32 1e-05, %v186_v31  ;;  %v146_v38 = vpop.xlane.xlu1 %145 }
  0x9f   :  { %v143_v39 = vpop.xlane.xlu0 %142  ;;  %1444 = vrsqrt.f32 %v219_v32  ;;  %v203_v42 = vmul.f32 0.015625, %v146_v38 }
  0xa0   :  { %v202_v45 = vmul.f32 0.015625, %v143_v39  ;;  %1446 = vrsqrt.f32 %v218_v37 }
  0xa1   :  { %v1437_v48 = vpop.eup %1436  ;;  %v235_v49 = vadd.f32 1e-05, %v203_v42 }
  0xa2   :  { %v234_v50 = vadd.f32 1e-05, %v202_v45  ;;  %v1439_v53 = vpop.eup %1438  ;;  %v296_v54 = vmul.f32 %v1437_v48, %v1545_v0  ;;  %v104_v57 = vpop.xlane.xlu1 %103 }
  0xa3   :  { %v101_v58 = vpop.xlane.xlu0 %100  ;;  %1448 = vrsqrt.f32 %v235_v49  ;;  %v189_v59 = vmul.f32 0.015625, %v104_v57  ;;  %v280_v62 = vmul.f32 %v1439_v53, %v1550_v1 }
  0xa4   :  { %v188_v60 = vmul.f32 0.015625, %v101_v58  ;;  %1450 = vrsqrt.f32 %v234_v50  ;;  %v335_v0 = vmul.f32 %v1829_v4, %v296_v54 }
  0xa5   :  { %v1441_v61 = vpop.eup %1440  ;;  %v221_v5 = vadd.f32 1e-05, %v189_v59  ;;  %v319_v27 = vmul.f32 %v1829_v4, %v280_v62 }
  0xa6   :  { %v220_v7 = vadd.f32 1e-05, %v188_v60  ;;  %v1443_v10 = vpop.eup %1442  ;;  %v297_v11 = vmul.f32 %v1441_v61, %v1555_v2  ;;  %v152_v12 = vpop.xlane.xlu1 %151 }
  0xa7   :  { %v149_v18 = vpop.xlane.xlu0 %148  ;;  %v281_v19 = vmul.f32 %v1443_v10, %v1566_v6  ;;  %1452 = vrsqrt.f32 %v221_v5  ;;  %v205_v20 = vmul.f32 0.015625, %v152_v12 }
  0xa8   :  { %v204_v21 = vmul.f32 0.015625, %v149_v18  ;;  %v336_v1 = vmul.f32 %v1829_v4, %v297_v11  ;;  %1454 = vrsqrt.f32 %v220_v7 }
  0xa9   :  { %v1445_v24 = vpop.eup %1444  ;;  %v320_v30 = vmul.f32 %v1829_v4, %v281_v19  ;;  %v237_v31 = vadd.f32 1e-05, %v205_v20 }
  0xaa   :  { %v236_v32 = vadd.f32 1e-05, %v204_v21  ;;  %v1447_v2 = vpop.eup %1446  ;;  %v359_v37 = vpack.c.bf16 %v336_v1, %v335_v0  ;;  %v283_v38 = vmul.f32 %v1445_v24, %v1573_v8  ;;  %v110_v39 = vpop.xlane.xlu1 %109 }
  0xab   :  { %v107_v42 = vpop.xlane.xlu0 %106  ;;  %v351_v6 = vpack.c.bf16 %v320_v30, %v319_v27  ;;  %1456 = vrsqrt.f32 %v237_v31  ;;  %v282_v45 = vmul.f32 %v1447_v2, %v1578_v9  ;;  %v191_v48 = vmul.f32 0.015625, %v110_v39 }
  0xac   :  { %1278 = vmatmul.mubr.msk.bf16.vlgmr.msra.gmra.mrb[0].mxu1 %vm86_vm0, %v359_v37  ;;  %1458 = vrsqrt.f32 %v236_v32  ;;  %v190_v49 = vmul.f32 0.015625, %v107_v42  ;;  %v322_v54 = vmul.f32 %v1829_v4, %v283_v38 }
  0xad   :  { %v1449_v50 = vpop.eup %1448  ;;  %1270 = vmatmul.mubr.msk.bf16.vlgmr.msra.gmra.mrb[0].mxu0 %vm86_vm0, %v351_v6  ;;  %v321_v53 = vmul.f32 %v1829_v4, %v282_v45  ;;  %597 = vmatprep.mubr.bf16.mxu1 %v1500_v13  ;;  %v223_v8 = vadd.f32 1e-05, %v191_v48 }
  0xae   :  { %v1451_v57 = vpop.eup %1450  ;;  %517 = vmatprep.mubr.bf16.mxu0 %v1500_v13  ;;  %v299_v9 = vmul.f32 %v1449_v50, %v1591_v16  ;;  %v222_v58 = vadd.f32 1e-05, %v190_v49  ;;  %v158_v59 = vpop.xlane.xlu1 %157 }
  0xaf   :  { %v155_v60 = vpop.xlane.xlu0 %154  ;;  %v298_v61 = vmul.f32 %v1451_v57, %v1596_v17  ;;  %1460 = vrsqrt.f32 %v223_v8  ;;  %v207_v62 = vmul.f32 0.015625, %v158_v59  ;;  %v352_v11 = vpack.c.bf16 %v322_v54, %v321_v53 }
  0xb0   :  { %v338_v5 = vmul.f32 %v1829_v4, %v299_v9  ;;  %1462 = vrsqrt.f32 %v222_v58  ;;  %v206_v7 = vmul.f32 0.015625, %v155_v60 }
  0xb1   :  { %v1453_v10 = vpop.eup %1452  ;;  %v337_v0 = vmul.f32 %v1829_v4, %v298_v61  ;;  %v239_v12 = vadd.f32 1e-05, %v207_v62 }
  0xb2   :  { %v1455_v18 = vpop.eup %1454  ;;  %v238_v19 = vadd.f32 1e-05, %v206_v7  ;;  %v285_v16 = vmul.f32 %v1453_v10, %v1607_v22  ;;  %v116_v20 = vpop.xlane.xlu1 %115 }
  0xb3   :  { %v113_v21 = vpop.xlane.xlu0 %112  ;;  %v360_v1 = vpack.c.bf16 %v338_v5, %v337_v0  ;;  %1464 = vrsqrt.f32 %v239_v12  ;;  %v284_v17 = vmul.f32 %v1455_v18, %v1612_v23  ;;  %v193_v24 = vmul.f32 0.015625, %v116_v20 }
  0xb4   :  { %1466 = vrsqrt.f32 %v238_v19  ;;  %v192_v27 = vmul.f32 0.015625, %v113_v21  ;;  %v324_v32 = vmul.f32 %v1829_v4, %v285_v16 }
  0xb5   :  { %v1457_v30 = vpop.eup %1456  ;;  %1271 = vmatmul.mubr.msk.bf16.gmra.mrb[4].mxu0 %vm86_vm0, %v352_v11  ;;  %1279 = vmatmul.mubr.msk.bf16.gmra.mrb[4].mxu1 %vm86_vm0, %v360_v1  ;;  %v323_v31 = vmul.f32 %v1829_v4, %v284_v17  ;;  %v225_v2 = vadd.f32 1e-05, %v193_v24 }
  0xb6   :  { %v1459_v22 = vpop.eup %1458  ;;  %527 = vmatprep.mubr.bf16.mxu0 %v1500_v13  ;;  %607 = vmatprep.mubr.bf16.mxu1 %v1500_v13  ;;  %v301_v23 = vmul.f32 %v1457_v30, %v1623_v28  ;;  %v224_v37 = vadd.f32 1e-05, %v192_v27  ;;  %v164_v38 = vpop.xlane.xlu1 %163 }
  0xb7   :  { %v161_v39 = vpop.xlane.xlu0 %160  ;;  %v300_v42 = vmul.f32 %v1459_v22, %v1628_v29  ;;  %1468 = vrsqrt.f32 %v225_v2  ;;  %v209_v6 = vmul.f32 0.015625, %v164_v38  ;;  %v353_v50 = vpack.c.bf16 %v324_v32, %v323_v31 }
  0xb8   :  { %v340_v45 = vmul.f32 %v1829_v4, %v301_v23  ;;  %1470 = vrsqrt.f32 %v224_v37  ;;  %v208_v48 = vmul.f32 0.015625, %v161_v39 }
  0xb9   :  { %v1461_v49 = vpop.eup %1460  ;;  %v339_v53 = vmul.f32 %v1829_v4, %v300_v42  ;;  %v241_v54 = vadd.f32 1e-05, %v209_v6 }
  0xba   :  { %v1463_v8 = vpop.eup %1462  ;;  %v240_v57 = vadd.f32 1e-05, %v208_v48  ;;  %v287_v28 = vmul.f32 %v1461_v49, %v1639_v34  ;;  %v122_v9 = vpop.xlane.xlu1 %121 }
  0xbb   :  { %v119_v58 = vpop.xlane.xlu0 %118  ;;  %v361_v59 = vpack.c.bf16 %v340_v45, %v339_v53  ;;  %1472 = vrsqrt.f32 %v241_v54  ;;  %v286_v29 = vmul.f32 %v1463_v8, %v1644_v35  ;;  %v195_v60 = vmul.f32 0.015625, %v122_v9 }
  0xbc   :  { %1474 = vrsqrt.f32 %v240_v57  ;;  %v194_v61 = vmul.f32 0.015625, %v119_v58  ;;  %v326_v7 = vmul.f32 %v1829_v4, %v287_v28 }
  0xbd   :  { %v1465_v62 = vpop.eup %1464  ;;  %1272 = vmatmul.mubr.msk.bf16.gmra.mrb[8].mxu0 %vm86_vm0, %v353_v50  ;;  %1280 = vmatmul.mubr.msk.bf16.gmra.mrb[8].mxu1 %vm86_vm0, %v361_v59  ;;  %v325_v5 = vmul.f32 %v1829_v4, %v286_v29  ;;  %v227_v10 = vadd.f32 1e-05, %v195_v60 }
  0xbe   :  { %v1467_v34 = vpop.eup %1466  ;;  %537 = vmatprep.mubr.bf16.mxu0 %v1500_v13  ;;  %617 = vmatprep.mubr.bf16.mxu1 %v1500_v13  ;;  %v303_v35 = vmul.f32 %v1465_v62, %v1655_v40  ;;  %v226_v11 = vadd.f32 1e-05, %v194_v61  ;;  %v170_v0 = vpop.xlane.xlu1 %169 }
  0xbf   :  { %v167_v12 = vpop.xlane.xlu0 %166  ;;  %v302_v18 = vmul.f32 %v1467_v34, %v1660_v41  ;;  %1476 = vrsqrt.f32 %v227_v10  ;;  %v211_v19 = vmul.f32 0.015625, %v170_v0  ;;  %v354_v1 = vpack.c.bf16 %v326_v7, %v325_v5 }
  0xc0   :  { %v342_v16 = vmul.f32 %v1829_v4, %v303_v35  ;;  %1478 = vrsqrt.f32 %v226_v11  ;;  %v210_v20 = vmul.f32 0.015625, %v167_v12 }
  0xc1   :  { %v1469_v21 = vpop.eup %1468  ;;  %v341_v17 = vmul.f32 %v1829_v4, %v302_v18  ;;  %v243_v24 = vadd.f32 1e-05, %v211_v19 }
  0xc2   :  { %v1471_v27 = vpop.eup %1470  ;;  %v242_v30 = vadd.f32 1e-05, %v210_v20  ;;  %v289_v40 = vmul.f32 %v1469_v21, %v1671_v46  ;;  %v128_v31 = vpop.xlane.xlu1 %127 }
  0xc3   :  { %v125_v32 = vpop.xlane.xlu0 %124  ;;  %v362_v2 = vpack.c.bf16 %v342_v16, %v341_v17  ;;  %1480 = vrsqrt.f32 %v243_v24  ;;  %v288_v41 = vmul.f32 %v1471_v27, %v1676_v47  ;;  %v197_v22 = vmul.f32 0.015625, %v128_v31 }
  0xc4   :  { %1482 = vrsqrt.f32 %v242_v30  ;;  %v196_v23 = vmul.f32 0.015625, %v125_v32  ;;  %v328_v39 = vmul.f32 %v1829_v4, %v289_v40 }
  0xc5   :  { %v1473_v37 = vpop.eup %1472  ;;  %1273 = vmatmul.mubr.msk.bf16.gmra.mrb[12].mxu0 %vm86_vm0, %v354_v1  ;;  %1281 = vmatmul.mubr.msk.bf16.gmra.mrb[12].mxu1 %vm86_vm0, %v362_v2  ;;  %v327_v38 = vmul.f32 %v1829_v4, %v288_v41  ;;  %v229_v42 = vadd.f32 1e-05, %v197_v22 }
  0xc6   :  { %v1475_v46 = vpop.eup %1474  ;;  %547 = vmatprep.mubr.bf16.mxu0 %v1500_v13  ;;  %627 = vmatprep.mubr.bf16.mxu1 %v1500_v13  ;;  %v305_v47 = vmul.f32 %v1473_v37, %v1696_v55  ;;  %v228_v6 = vadd.f32 1e-05, %v196_v23  ;;  %v176_v45 = vpop.xlane.xlu1 %175 }
  0xc7   :  { %v173_v48 = vpop.xlane.xlu0 %172  ;;  %v304_v49 = vmul.f32 %v1475_v46, %v1701_v56  ;;  %1484 = vrsqrt.f32 %v229_v42  ;;  %v213_v50 = vmul.f32 0.015625, %v176_v45  ;;  %v355_v57 = vpack.c.bf16 %v328_v39, %v327_v38 }
  0xc8   :  { %v344_v53 = vmul.f32 %v1829_v4, %v305_v47  ;;  %1486 = vrsqrt.f32 %v228_v6  ;;  %v212_v54 = vmul.f32 0.015625, %v173_v48 }
  0xc9   :  { %v1477_v8 = vpop.eup %1476  ;;  %v343_v28 = vmul.f32 %v1829_v4, %v304_v49  ;;  %v245_v9 = vadd.f32 1e-05, %v213_v50 }
  0xca   :  { %v1479_v58 = vpop.eup %1478  ;;  %v244_v59 = vadd.f32 1e-05, %v212_v54  ;;  %v291_v55 = vmul.f32 %v1477_v8, %v1718_v63  ;;  %v134_v29 = vpop.xlane.xlu1 %133  ;;  %v377_v54 = vlaneseq }
  0xcb   :  { %v131_v60 = vpop.xlane.xlu0 %130  ;;  %v363_v61 = vpack.c.bf16 %v344_v53, %v343_v28  ;;  %1488 = vrsqrt.f32 %v245_v9  ;;  %v290_v56 = vmul.f32 %v1479_v58, %v1723_v3  ;;  %v199_v62 = vmul.f32 0.015625, %v134_v29 }
  0xcc   :  { %1490 = vrsqrt.f32 %v244_v59  ;;  %v198_v5 = vmul.f32 0.015625, %v131_v60  ;;  %v330_v34 = vmul.f32 %v1829_v4, %v291_v55  ;;  %v378_v8 = vshrl.u32 %v377_v54, 7 }
  0xcd   :  { %v1481_v7 = vpop.eup %1480  ;;  %1274 = vmatmul.mubr.msk.bf16.gmra.mrb[16].mxu0 %vm86_vm0, %v355_v57  ;;  %1282 = vmatmul.mubr.msk.bf16.gmra.mrb[16].mxu1 %vm86_vm0, %v363_v61  ;;  %v329_v10 = vmul.f32 %v1829_v4, %v290_v56  ;;  %v231_v35 = vadd.f32 1e-05, %v199_v62 }
  0xce   :  { %v1483_v63 = vpop.eup %1482  ;;  %557 = vmatprep.mubr.bf16.mxu0 %v1500_v13  ;;  %637 = vmatprep.mubr.bf16.mxu1 %v1500_v13  ;;  %v307_v3 = vmul.f32 %v1481_v7, %v1742_v14  ;;  %v230_v11 = vadd.f32 1e-05, %v198_v5  ;;  %v182_v0 = vpop.xlane.xlu1 %181  ;;  %v379_v57 = vsub.s32 0, %v378_v8 }
  0xcf   :  { %v179_v12 = vpop.xlane.xlu0 %178  ;;  %v306_v18 = vmul.f32 %v1483_v63, %v1747_v15  ;;  %1492 = vrsqrt.f32 %v231_v35  ;;  %v215_v19 = vmul.f32 0.015625, %v182_v0  ;;  %v356_v1 = vpack.c.bf16 %v330_v34, %v329_v10 }
  0xd0   :  { %v346_v16 = vmul.f32 %v1829_v4, %v307_v3  ;;  %1494 = vrsqrt.f32 %v230_v11  ;;  %v214_v20 = vmul.f32 0.015625, %v179_v12 }
  0xd1   :  { %v1485_v21 = vpop.eup %1484  ;;  %v345_v17 = vmul.f32 %v1829_v4, %v306_v18  ;;  %v247_v24 = vadd.f32 1e-05, %v215_v19 }
  0xd2   :  { %v1487_v27 = vpop.eup %1486  ;;  %v246_v30 = vadd.f32 1e-05, %v214_v20  ;;  %v293_v14 = vmul.f32 %v1485_v21, %v1761_v25 }
  0xd3   :  { %v364_v40 = vpack.c.bf16 %v346_v16, %v345_v17  ;;  %1496 = vrsqrt.f32 %v247_v24  ;;  %v292_v31 = vmul.f32 %v1487_v27, %v1766_v26 }
  0xd4   :  { %1498 = vrsqrt.f32 %v246_v30  ;;  %v332_v2 = vmul.f32 %v1829_v4, %v293_v14 }
  0xd5   :  { %v1489_v15 = vpop.eup %1488  ;;  %1275 = vmatmul.mubr.msk.bf16.gmra.mrb[20].mxu0 %vm86_vm0, %v356_v1  ;;  %1283 = vmatmul.mubr.msk.bf16.gmra.mrb[20].mxu1 %vm86_vm0, %v364_v40  ;;  %v331_v32 = vmul.f32 %v1829_v4, %v292_v31 }
  0xd6   :  { %v1491_v41 = vpop.eup %1490  ;;  %567 = vmatprep.mubr.bf16.mxu0 %v1500_v13  ;;  %647 = vmatprep.mubr.bf16.mxu1 %v1500_v13  ;;  %v309_v25 = vmul.f32 %v1489_v15, %v1777_v33 }
  0xd7   :  { %v308_v22 = vmul.f32 %v1491_v41, %v1782_v36  ;;  %v357_v37 = vpack.c.bf16 %v332_v2, %v331_v32 }
  0xd8   :  { %v348_v26 = vmul.f32 %v1829_v4, %v309_v25 }
  0xd9   :  { %v1493_v23 = vpop.eup %1492  ;;  %v347_v38 = vmul.f32 %v1829_v4, %v308_v22 }
  0xda   :  { %v1495_v39 = vpop.eup %1494  ;;  %v295_v42 = vmul.f32 %v1493_v23, %v1793_v43 }
  0xdb   :  { %v365_v46 = vpack.c.bf16 %v348_v26, %v347_v38  ;;  %v294_v47 = vmul.f32 %v1495_v39, %v1798_v44 }
  0xdc   :  { %v334_v36 = vmul.f32 %v1829_v4, %v295_v42 }
  0xdd   :  { %v1497_v6 = vpop.eup %1496  ;;  %1276 = vmatmul.mubr.msk.bf16.gmra.mrb[24].mxu0 %vm86_vm0, %v357_v37  ;;  %1284 = vmatmul.mubr.msk.bf16.gmra.mrb[24].mxu1 %vm86_vm0, %v365_v46  ;;  %v333_v33 = vmul.f32 %v1829_v4, %v294_v47 }
  0xde   :  { %v1499_v45 = vpop.eup %1498  ;;  %577 = vmatprep.mubr.bf16.mxu0 %v1500_v13  ;;  %657 = vmatprep.mubr.bf16.mxu1 %v1500_v13  ;;  %v311_v48 = vmul.f32 %v1497_v6, %v1809_v51  ;;  %v375_v13 = vld [vmem:[%s2745_s3] sm:$0x3]  ;;  %v383_v51 = vsub.s32 1, %v378_v8 }
  0xdf   :  { %v310_v43 = vmul.f32 %v1499_v45, %v1814_v52  ;;  %v358_v49 = vpack.c.bf16 %v334_v36, %v333_v33  ;;  %v1926_v28 = vrot.slane %v375_v13, %v379_v57 }
  0xe0   :  { %v350_v44 = vmul.f32 %v1829_v4, %v311_v48  ;;  %v1928_v52 = vrot.slane %v375_v13, %v383_v51 }
  0xe1   :  { %v349_v50 = vmul.f32 %v1829_v4, %v310_v43 }
  0xe3   :  { %v366_v53 = vpack.c.bf16 %v350_v44, %v349_v50 }
  0xe5   :  { %1277 = vmatmul.mubr.msk.bf16.gmra.mrb[28].mxu0 %vm86_vm0, %v358_v49  ;;  %1285 = vmatmul.mubr.msk.bf16.gmra.mrb[28].mxu1 %vm86_vm0, %v366_v53 }
 0x17f   :  { %v589_v9 = vpop.f32.mrb[0].mxu1 }
 0x180   :  { %v509_v58 = vpop.f32.mrb[0].mxu0  ;;  %v590_v4 = vadd.f32 %v589_v9, %v1926_v28  ;;  %v591_v59 = vpop.f32.mrb[1].mxu1 }
 0x181   :  { %v510_v55 = vadd.f32 %v509_v58, %v1926_v28  ;;  %v511_v29 = vpop.f32.mrb[1].mxu0  ;;  %v592_v60 = vadd.f32 %v591_v59, %v1928_v52  ;;  %v593_v61 = vpop.f32.mrb[2].mxu1 }
 0x182   :  { %v1366_v56 = vpack.c.bf16 %v590_v4, %v590_v4  ;;  %v512_v62 = vadd.f32 %v511_v29, %v1928_v52  ;;  %v513_v5 = vpop.f32.mrb[2].mxu0  ;;  %v594_v7 = vadd.f32 %v593_v61, %v1926_v28  ;;  %v595_v10 = vpop.f32.mrb[3].mxu1 }
 0x183   :  { %v1350_v34 = vpack.c.bf16 %v510_v55, %v510_v55  ;;  %v1398_v35 = vpack.c.bf16 %v592_v60, %v592_v60  ;;  %v514_v63 = vadd.f32 %v513_v5, %v1926_v28  ;;  %v515_v3 = vpop.f32.mrb[3].mxu0  ;;  %v596_v11 = vadd.f32 %v595_v10, %v1928_v52 }
 0x184   :  { %813 = vst.msk [vmem:[%s2746_s4 + $0x40] sm:$0xf] %vm796_vm1, %v1366_v56  ;;  %v1382_v0 = vpack.c.bf16 %v512_v62, %v512_v62  ;;  %v1367_v12 = vpack.c.bf16 %v594_v7, %v594_v7  ;;  %v516_v18 = vadd.f32 %v515_v3, %v1928_v52 }
 0x185   :  { %797 = vst.msk [vmem:[%s2746_s4] sm:$0xf] %vm796_vm1, %v1350_v34  ;;  %1101 = vst.msk [vmem:[%s2747_s6 + $0x40] sm:$0xf] %vm796_vm1, %v1398_v35  ;;  %v1351_v19 = vpack.c.bf16 %v514_v63, %v514_v63  ;;  %v1399_v16 = vpack.c.bf16 %v596_v11, %v596_v11  ;;  %829 = vrot.lane.b32.xlu0 %v1350_v34, %s1501_s18 }
 0x186   :  { %1085 = vst.msk [vmem:[%s2747_s6] sm:$0xf] %vm796_vm1, %v1382_v0  ;;  %814 = vst.msk [vmem:[%s2746_s4 + $0x44] sm:$0xf] %vm796_vm1, %v1367_v12  ;;  %v1383_v20 = vpack.c.bf16 %v516_v18, %v516_v18 }
 0x187   :  { %798 = vst.msk [vmem:[%s2746_s4 + $0x4] sm:$0xf] %vm796_vm1, %v1351_v19  ;;  %1102 = vst.msk [vmem:[%s2747_s6 + $0x44] sm:$0xf] %vm796_vm1, %v1399_v16  ;;  %831 = vrot.lane.b32.xlu1 %v1351_v19, %s1501_s18 }
 0x188   :  { %1086 = vst.msk [vmem:[%s2747_s6 + $0x4] sm:$0xf] %vm796_vm1, %v1383_v20  ;;  %v519_v21 = vpop.f32.mrb[4].mxu0  ;;  %v599_v1 = vpop.f32.mrb[4].mxu1 }
 0x189   :  { %861 = vrot.lane.b32.xlu0 %v1366_v56, %s1501_s18  ;;  %v520_v17 = vadd.f32 %v519_v21, %v1926_v28  ;;  %v521_v24 = vpop.f32.mrb[5].mxu0  ;;  %v600_v27 = vadd.f32 %v599_v1, %v1926_v28  ;;  %v601_v30 = vpop.f32.mrb[5].mxu1 }
 0x18a   :  { %v522_v14 = vadd.f32 %v521_v24, %v1928_v52  ;;  %v523_v40 = vpop.f32.mrb[6].mxu0  ;;  %v602_v31 = vadd.f32 %v601_v30, %v1928_v52  ;;  %v603_v15 = vpop.f32.mrb[6].mxu1 }
 0x18b   :  { %863 = vrot.lane.b32.xlu1 %v1367_v12, %s1501_s18  ;;  %v1352_v32 = vpack.c.bf16 %v520_v17, %v520_v17  ;;  %v1368_v2 = vpack.c.bf16 %v600_v27, %v600_v27  ;;  %v524_v41 = vadd.f32 %v523_v40, %v1926_v28  ;;  %v525_v25 = vpop.f32.mrb[7].mxu0  ;;  %v604_v22 = vadd.f32 %v603_v15, %v1926_v28  ;;  %v605_v26 = vpop.f32.mrb[7].mxu1 }
 0x18c   :  { %v1384_v23 = vpack.c.bf16 %v522_v14, %v522_v14  ;;  %v526_v37 = vadd.f32 %v525_v25, %v1928_v52  ;;  %v1981_v38 = vpack.c.bf16 %v602_v31, %v602_v31  ;;  %v606_v39 = vadd.f32 %v605_v26, %v1928_v52 }
 0x18d   :  { %1117 = vrot.lane.b32.xlu0 %v1382_v0, %s1501_s18  ;;  %799 = vst.msk [vmem:[%s2746_s4 + $0x8] sm:$0xf] %vm796_vm1, %v1352_v32  ;;  %815 = vst.msk [vmem:[%s2746_s4 + $0x48] sm:$0xf] %vm796_vm1, %v1368_v2  ;;  %v1353_v42 = vpack.c.bf16 %v524_v41, %v524_v41  ;;  %v1993_v46 = vpack.c.bf16 %v604_v22, %v604_v22 }
 0x18e   :  { %1087 = vst.msk [vmem:[%s2747_s6 + $0x8] sm:$0xf] %vm796_vm1, %v1384_v23  ;;  %v1999_v47 = vpack.c.bf16 %v526_v37, %v526_v37  ;;  %1103 = vst.msk [vmem:[%s2747_s6 + $0x48] sm:$0xf] %vm796_vm1, %v1981_v38  ;;  %v2006_v6 = vpack.c.bf16 %v606_v39, %v606_v39 }
 0x18f   :  { %1119 = vrot.lane.b32.xlu1 %v1383_v20, %s1501_s18  ;;  %800 = vst.msk [vmem:[%s2746_s4 + $0xc] sm:$0xf] %vm796_vm1, %v1353_v42  ;;  %816 = vst.msk [vmem:[%s2746_s4 + $0x4c] sm:$0xf] %vm796_vm1, %v1993_v46 }
 0x190   :  { %1088 = vst.msk [vmem:[%s2747_s6 + $0xc] sm:$0xf] %vm796_vm1, %v1999_v47  ;;  %1104 = vst.msk [vmem:[%s2747_s6 + $0x4c] sm:$0xf] %vm796_vm1, %v2006_v6  ;;  %v529_v33 = vpop.f32.mrb[8].mxu0  ;;  %v609_v36 = vpop.f32.mrb[8].mxu1 }
 0x191   :  { %1149 = vrot.lane.b32.xlu0 %v1398_v35, %s1501_s18  ;;  %v530_v45 = vadd.f32 %v529_v33, %v1926_v28  ;;  %v610_v48 = vadd.f32 %v609_v36, %v1926_v28  ;;  %v531_v43 = vpop.f32.mrb[9].mxu0  ;;  %v611_v44 = vpop.f32.mrb[9].mxu1 }
 0x192   :  { %v532_v49 = vadd.f32 %v531_v43, %v1928_v52  ;;  %v533_v50 = vpop.f32.mrb[10].mxu0  ;;  %v612_v53 = vadd.f32 %v611_v44, %v1928_v52  ;;  %v613_v54 = vpop.f32.mrb[10].mxu1 }
 0x193   :  { %1151 = vrot.lane.b32.xlu1 %v1399_v16, %s1501_s18  ;;  %v1354_v8 = vpack.c.bf16 %v530_v45, %v530_v45  ;;  %v2034_v57 = vpack.c.bf16 %v610_v48, %v610_v48  ;;  %v534_v13 = vadd.f32 %v533_v50, %v1926_v28  ;;  %v535_v51 = vpop.f32.mrb[11].mxu0  ;;  %v614_v9 = vadd.f32 %v613_v54, %v1926_v28  ;;  %v615_v58 = vpop.f32.mrb[11].mxu1 }
 0x194   :  { %v2038_v4 = vpack.c.bf16 %v532_v49, %v532_v49  ;;  %v536_v59 = vadd.f32 %v535_v51, %v1928_v52  ;;  %v2041_v55 = vpack.c.bf16 %v612_v53, %v612_v53  ;;  %v616_v29 = vadd.f32 %v615_v58, %v1928_v52 }
 0x195   :  { %865 = vrot.lane.b32.xlu0 %v1368_v2, %s1501_s18  ;;  %801 = vst.msk [vmem:[%s2746_s4 + $0x10] sm:$0xf] %vm796_vm1, %v1354_v8  ;;  %817 = vst.msk [vmem:[%s2746_s4 + $0x50] sm:$0xf] %vm796_vm1, %v2034_v57  ;;  %v2054_v60 = vpack.c.bf16 %v534_v13, %v534_v13  ;;  %v2056_v61 = vpack.c.bf16 %v614_v9, %v614_v9 }
 0x196   :  { %1089 = vst.msk [vmem:[%s2747_s6 + $0x10] sm:$0xf] %vm796_vm1, %v2038_v4  ;;  %v2063_v56 = vpack.c.bf16 %v536_v59, %v536_v59  ;;  %1105 = vst.msk [vmem:[%s2747_s6 + $0x50] sm:$0xf] %vm796_vm1, %v2041_v55  ;;  %v2070_v62 = vpack.c.bf16 %v616_v29, %v616_v29 }
 0x197   :  { %833 = vrot.lane.b32.xlu1 %v1352_v32, %s1501_s18  ;;  %802 = vst.msk [vmem:[%s2746_s4 + $0x14] sm:$0xf] %vm796_vm1, %v2054_v60  ;;  %818 = vst.msk [vmem:[%s2746_s4 + $0x54] sm:$0xf] %vm796_vm1, %v2056_v61 }
 0x198   :  { %1090 = vst.msk [vmem:[%s2747_s6 + $0x14] sm:$0xf] %vm796_vm1, %v2063_v56  ;;  %1106 = vst.msk [vmem:[%s2747_s6 + $0x54] sm:$0xf] %vm796_vm1, %v2070_v62  ;;  %v539_v5 = vpop.f32.mrb[12].mxu0  ;;  %v619_v7 = vpop.f32.mrb[12].mxu1 }
 0x199   :  { %1121 = vrot.lane.b32.xlu0 %v1384_v23, %s1501_s18  ;;  %v540_v10 = vadd.f32 %v539_v5, %v1926_v28  ;;  %v620_v34 = vadd.f32 %v619_v7, %v1926_v28  ;;  %v541_v35 = vpop.f32.mrb[13].mxu0  ;;  %v621_v63 = vpop.f32.mrb[13].mxu1 }
 0x19a   :  { %v542_v3 = vadd.f32 %v541_v35, %v1928_v52  ;;  %v543_v11 = vpop.f32.mrb[14].mxu0  ;;  %v622_v0 = vadd.f32 %v621_v63, %v1928_v52  ;;  %v623_v12 = vpop.f32.mrb[14].mxu1 }
 0x19b   :  { %835 = vrot.lane.b32.xlu1 %v1353_v42, %s1501_s18  ;;  %v2099_v18 = vpack.c.bf16 %v540_v10, %v540_v10  ;;  %v2101_v19 = vpack.c.bf16 %v620_v34, %v620_v34  ;;  %v544_v16 = vadd.f32 %v543_v11, %v1926_v28  ;;  %v545_v20 = vpop.f32.mrb[15].mxu0  ;;  %v624_v21 = vadd.f32 %v623_v12, %v1926_v28  ;;  %v625_v1 = vpop.f32.mrb[15].mxu1 }
 0x19c   :  { %v2105_v17 = vpack.c.bf16 %v542_v3, %v542_v3  ;;  %v546_v24 = vadd.f32 %v545_v20, %v1928_v52  ;;  %v2108_v27 = vpack.c.bf16 %v622_v0, %v622_v0  ;;  %v626_v30 = vadd.f32 %v625_v1, %v1928_v52 }
 0x19d   :  { %1153 = vrot.lane.b32.xlu0 %v1981_v38, %s1501_s18  ;;  %803 = vst.msk [vmem:[%s2746_s4 + $0x18] sm:$0xf] %vm796_vm1, %v2099_v18  ;;  %819 = vst.msk [vmem:[%s2746_s4 + $0x58] sm:$0xf] %vm796_vm1, %v2101_v19  ;;  %v2123_v14 = vpack.c.bf16 %v544_v16, %v544_v16  ;;  %v2125_v40 = vpack.c.bf16 %v624_v21, %v624_v21 }
 0x19e   :  { %1091 = vst.msk [vmem:[%s2747_s6 + $0x18] sm:$0xf] %vm796_vm1, %v2105_v17  ;;  %v2132_v31 = vpack.c.bf16 %v546_v24, %v546_v24  ;;  %1107 = vst.msk [vmem:[%s2747_s6 + $0x58] sm:$0xf] %vm796_vm1, %v2108_v27  ;;  %v2139_v15 = vpack.c.bf16 %v626_v30, %v626_v30 }
 0x19f   :  { %867 = vrot.lane.b32.xlu1 %v1993_v46, %s1501_s18  ;;  %804 = vst.msk [vmem:[%s2746_s4 + $0x1c] sm:$0xf] %vm796_vm1, %v2123_v14  ;;  %820 = vst.msk [vmem:[%s2746_s4 + $0x5c] sm:$0xf] %vm796_vm1, %v2125_v40 }
 0x1a0   :  { %1092 = vst.msk [vmem:[%s2747_s6 + $0x1c] sm:$0xf] %vm796_vm1, %v2132_v31  ;;  %1108 = vst.msk [vmem:[%s2747_s6 + $0x5c] sm:$0xf] %vm796_vm1, %v2139_v15  ;;  %v549_v32 = vpop.f32.mrb[16].mxu0  ;;  %v629_v2 = vpop.f32.mrb[16].mxu1 }
 0x1a1   :  { %837 = vrot.lane.b32.xlu0 %v1354_v8, %s1501_s18  ;;  %v550_v41 = vadd.f32 %v549_v32, %v1926_v28  ;;  %v630_v25 = vadd.f32 %v629_v2, %v1926_v28  ;;  %v551_v22 = vpop.f32.mrb[17].mxu0  ;;  %v631_v26 = vpop.f32.mrb[17].mxu1 }
 0x1a2   :  { %v552_v23 = vadd.f32 %v551_v22, %v1928_v52  ;;  %v553_v37 = vpop.f32.mrb[18].mxu0  ;;  %v632_v38 = vadd.f32 %v631_v26, %v1928_v52  ;;  %v633_v39 = vpop.f32.mrb[18].mxu1 }
 0x1a3   :  { %1123 = vrot.lane.b32.xlu1 %v1999_v47, %s1501_s18  ;;  %v2170_v42 = vpack.c.bf16 %v550_v41, %v550_v41  ;;  %v2172_v46 = vpack.c.bf16 %v630_v25, %v630_v25  ;;  %v554_v33 = vadd.f32 %v553_v37, %v1926_v28  ;;  %v555_v36 = vpop.f32.mrb[19].mxu0  ;;  %v634_v45 = vadd.f32 %v633_v39, %v1926_v28  ;;  %v635_v48 = vpop.f32.mrb[19].mxu1 }
 0x1a4   :  { %v2176_v43 = vpack.c.bf16 %v552_v23, %v552_v23  ;;  %v556_v44 = vadd.f32 %v555_v36, %v1928_v52  ;;  %v2179_v49 = vpack.c.bf16 %v632_v38, %v632_v38  ;;  %v636_v50 = vadd.f32 %v635_v48, %v1928_v52 }
 0x1a5   :  { %869 = vrot.lane.b32.xlu0 %v2034_v57, %s1501_s18  ;;  %805 = vst.msk [vmem:[%s2746_s4 + $0x20] sm:$0xf] %vm796_vm1, %v2170_v42  ;;  %821 = vst.msk [vmem:[%s2746_s4 + $0x60] sm:$0xf] %vm796_vm1, %v2172_v46  ;;  %v2194_v47 = vpack.c.bf16 %v554_v33, %v554_v33  ;;  %v2196_v53 = vpack.c.bf16 %v634_v45, %v634_v45 }
 0x1a6   :  { %1093 = vst.msk [vmem:[%s2747_s6 + $0x20] sm:$0xf] %vm796_vm1, %v2176_v43  ;;  %v2203_v54 = vpack.c.bf16 %v556_v44, %v556_v44  ;;  %1109 = vst.msk [vmem:[%s2747_s6 + $0x60] sm:$0xf] %vm796_vm1, %v2179_v49  ;;  %v2210_v8 = vpack.c.bf16 %v636_v50, %v636_v50 }
 0x1a7   :  { %1155 = vrot.lane.b32.xlu1 %v2006_v6, %s1501_s18  ;;  %806 = vst.msk [vmem:[%s2746_s4 + $0x24] sm:$0xf] %vm796_vm1, %v2194_v47  ;;  %822 = vst.msk [vmem:[%s2746_s4 + $0x64] sm:$0xf] %vm796_vm1, %v2196_v53 }
 0x1a8   :  { %1094 = vst.msk [vmem:[%s2747_s6 + $0x24] sm:$0xf] %vm796_vm1, %v2203_v54  ;;  %1110 = vst.msk [vmem:[%s2747_s6 + $0x64] sm:$0xf] %vm796_vm1, %v2210_v8  ;;  %v559_v6 = vpop.f32.mrb[20].mxu0  ;;  %v639_v57 = vpop.f32.mrb[20].mxu1 }
 0x1a9   :  { %1125 = vrot.lane.b32.xlu0 %v2038_v4, %s1501_s18  ;;  %v560_v13 = vadd.f32 %v559_v6, %v1926_v28  ;;  %v640_v51 = vadd.f32 %v639_v57, %v1926_v28  ;;  %v561_v9 = vpop.f32.mrb[21].mxu0  ;;  %v641_v58 = vpop.f32.mrb[21].mxu1 }
 0x1aa   :  { %v562_v59 = vadd.f32 %v561_v9, %v1928_v52  ;;  %v563_v29 = vpop.f32.mrb[22].mxu0  ;;  %v642_v5 = vadd.f32 %v641_v58, %v1928_v52  ;;  %v643_v7 = vpop.f32.mrb[22].mxu1 }
 0x1ab   :  { %839 = vrot.lane.b32.xlu1 %v2054_v60, %s1501_s18  ;;  %v2242_v10 = vpack.c.bf16 %v560_v13, %v560_v13  ;;  %v2244_v34 = vpack.c.bf16 %v640_v51, %v640_v51  ;;  %v564_v4 = vadd.f32 %v563_v29, %v1926_v28  ;;  %v565_v35 = vpop.f32.mrb[23].mxu0  ;;  %v644_v63 = vadd.f32 %v643_v7, %v1926_v28  ;;  %v645_v3 = vpop.f32.mrb[23].mxu1 }
 0x1ac   :  { %v2248_v11 = vpack.c.bf16 %v562_v59, %v562_v59  ;;  %v566_v0 = vadd.f32 %v565_v35, %v1928_v52  ;;  %v2251_v12 = vpack.c.bf16 %v642_v5, %v642_v5  ;;  %v646_v16 = vadd.f32 %v645_v3, %v1928_v52 }
 0x1ad   :  { %1157 = vrot.lane.b32.xlu0 %v2041_v55, %s1501_s18  ;;  %807 = vst.msk [vmem:[%s2746_s4 + $0x28] sm:$0xf] %vm796_vm1, %v2242_v10  ;;  %823 = vst.msk [vmem:[%s2746_s4 + $0x68] sm:$0xf] %vm796_vm1, %v2244_v34  ;;  %v2266_v60 = vpack.c.bf16 %v564_v4, %v564_v4  ;;  %v2268_v20 = vpack.c.bf16 %v644_v63, %v644_v63 }
 0x1ae   :  { %1095 = vst.msk [vmem:[%s2747_s6 + $0x28] sm:$0xf] %vm796_vm1, %v2248_v11  ;;  %v2275_v55 = vpack.c.bf16 %v566_v0, %v566_v0  ;;  %1111 = vst.msk [vmem:[%s2747_s6 + $0x68] sm:$0xf] %vm796_vm1, %v2251_v12  ;;  %v2282_v21 = vpack.c.bf16 %v646_v16, %v646_v16 }
 0x1af   :  { %871 = vrot.lane.b32.xlu1 %v2056_v61, %s1501_s18  ;;  %808 = vst.msk [vmem:[%s2746_s4 + $0x2c] sm:$0xf] %vm796_vm1, %v2266_v60  ;;  %824 = vst.msk [vmem:[%s2746_s4 + $0x6c] sm:$0xf] %vm796_vm1, %v2268_v20 }
 0x1b0   :  { %1096 = vst.msk [vmem:[%s2747_s6 + $0x2c] sm:$0xf] %vm796_vm1, %v2275_v55  ;;  %1112 = vst.msk [vmem:[%s2747_s6 + $0x6c] sm:$0xf] %vm796_vm1, %v2282_v21  ;;  %v569_v61 = vpop.f32.mrb[24].mxu0  ;;  %v649_v1 = vpop.f32.mrb[24].mxu1 }
 0x1b1   :  { %841 = vrot.lane.b32.xlu0 %v2099_v18, %s1501_s18  ;;  %v570_v24 = vadd.f32 %v569_v61, %v1926_v28  ;;  %v650_v30 = vadd.f32 %v649_v1, %v1926_v28  ;;  %v571_v32 = vpop.f32.mrb[25].mxu0  ;;  %v651_v2 = vpop.f32.mrb[25].mxu1 }
 0x1b2   :  { %v572_v41 = vadd.f32 %v571_v32, %v1928_v52  ;;  %v573_v25 = vpop.f32.mrb[26].mxu0  ;;  %v652_v22 = vadd.f32 %v651_v2, %v1928_v52  ;;  %v653_v26 = vpop.f32.mrb[26].mxu1 }
 0x1b3   :  { %1127 = vrot.lane.b32.xlu1 %v2063_v56, %s1501_s18  ;;  %v2314_v23 = vpack.c.bf16 %v570_v24, %v570_v24  ;;  %v2316_v37 = vpack.c.bf16 %v650_v30, %v650_v30  ;;  %v574_v18 = vadd.f32 %v573_v25, %v1926_v28  ;;  %v575_v38 = vpop.f32.mrb[27].mxu0  ;;  %v654_v39 = vadd.f32 %v653_v26, %v1926_v28  ;;  %v655_v33 = vpop.f32.mrb[27].mxu1 }
 0x1b4   :  { %v2320_v36 = vpack.c.bf16 %v572_v41, %v572_v41  ;;  %v576_v45 = vadd.f32 %v575_v38, %v1928_v52  ;;  %v2323_v48 = vpack.c.bf16 %v652_v22, %v652_v22  ;;  %v656_v44 = vadd.f32 %v655_v33, %v1928_v52 }
 0x1b5   :  { %873 = vrot.lane.b32.xlu0 %v2101_v19, %s1501_s18  ;;  %809 = vst.msk [vmem:[%s2746_s4 + $0x30] sm:$0xf] %vm796_vm1, %v2314_v23  ;;  %825 = vst.msk [vmem:[%s2746_s4 + $0x70] sm:$0xf] %vm796_vm1, %v2316_v37  ;;  %v2338_v56 = vpack.c.bf16 %v574_v18, %v574_v18  ;;  %v2340_v50 = vpack.c.bf16 %v654_v39, %v654_v39 }
 0x1b6   :  { %1097 = vst.msk [vmem:[%s2747_s6 + $0x30] sm:$0xf] %vm796_vm1, %v2320_v36  ;;  %v2347_v19 = vpack.c.bf16 %v576_v45, %v576_v45  ;;  %1113 = vst.msk [vmem:[%s2747_s6 + $0x70] sm:$0xf] %vm796_vm1, %v2323_v48  ;;  %v2354_v6 = vpack.c.bf16 %v656_v44, %v656_v44 }
 0x1b7   :  { %1159 = vrot.lane.b32.xlu1 %v2070_v62, %s1501_s18  ;;  %810 = vst.msk [vmem:[%s2746_s4 + $0x34] sm:$0xf] %vm796_vm1, %v2338_v56  ;;  %826 = vst.msk [vmem:[%s2746_s4 + $0x74] sm:$0xf] %vm796_vm1, %v2340_v50 }
 0x1b8   :  { %1098 = vst.msk [vmem:[%s2747_s6 + $0x34] sm:$0xf] %vm796_vm1, %v2347_v19  ;;  %1114 = vst.msk [vmem:[%s2747_s6 + $0x74] sm:$0xf] %vm796_vm1, %v2354_v6  ;;  %v579_v62 = vpop.f32.mrb[28].mxu0  ;;  %v659_v57 = vpop.f32.mrb[28].mxu1 }
 0x1b9   :  { %1129 = vrot.lane.b32.xlu0 %v2105_v17, %s1501_s18  ;;  %v580_v13 = vadd.f32 %v579_v62, %v1926_v28  ;;  %v660_v51 = vadd.f32 %v659_v57, %v1926_v28  ;;  %v581_v9 = vpop.f32.mrb[29].mxu0  ;;  %v661_v58 = vpop.f32.mrb[29].mxu1 }
 0x1ba   :  { %v582_v59 = vadd.f32 %v581_v9, %v1928_v52  ;;  %v583_v29 = vpop.f32.mrb[30].mxu0  ;;  %v662_v5 = vadd.f32 %v661_v58, %v1928_v52  ;;  %v663_v7 = vpop.f32.mrb[30].mxu1 }
 0x1bb   :  { %843 = vrot.lane.b32.xlu1 %v2123_v14, %s1501_s18  ;;  %v1364_v4 = vpack.c.bf16 %v580_v13, %v580_v13  ;;  %v1380_v35 = vpack.c.bf16 %v660_v51, %v660_v51  ;;  %v584_v63 = vadd.f32 %v583_v29, %v1926_v28  ;;  %v585_v17 = vpop.f32.mrb[31].mxu0  ;;  %v664_v3 = vadd.f32 %v663_v7, %v1926_v28  ;;  %v665_v0 = vpop.f32.mrb[31].mxu1 }
 0x1bc   :  { %v1396_v16 = vpack.c.bf16 %v582_v59, %v582_v59  ;;  %v586_v61 = vadd.f32 %v585_v17, %v1928_v52  ;;  %v1412_v1 = vpack.c.bf16 %v662_v5, %v662_v5  ;;  %v666_v24 = vadd.f32 %v665_v0, %v1928_v52 }
 0x1bd   :  { %1161 = vrot.lane.b32.xlu0 %v2108_v27, %s1501_s18  ;;  %811 = vst.msk [vmem:[%s2746_s4 + $0x38] sm:$0xf] %vm796_vm1, %v1364_v4  ;;  %827 = vst.msk [vmem:[%s2746_s4 + $0x78] sm:$0xf] %vm796_vm1, %v1380_v35  ;;  %v1365_v28 = vpack.c.bf16 %v584_v63, %v584_v63  ;;  %v1381_v14 = vpack.c.bf16 %v664_v3, %v664_v3 }
 0x1be   :  { %1099 = vst.msk [vmem:[%s2747_s6 + $0x38] sm:$0xf] %vm796_vm1, %v1396_v16  ;;  %v1397_v52 = vpack.c.bf16 %v586_v61, %v586_v61  ;;  %1115 = vst.msk [vmem:[%s2747_s6 + $0x78] sm:$0xf] %vm796_vm1, %v1412_v1  ;;  %v1413_v27 = vpack.c.bf16 %v666_v24, %v666_v24 }
 0x1bf   :  { %875 = vrot.lane.b32.xlu1 %v2125_v40, %s1501_s18  ;;  %812 = vst.msk [vmem:[%s2746_s4 + $0x3c] sm:$0xf] %vm796_vm1, %v1365_v28  ;;  %828 = vst.msk [vmem:[%s2746_s4 + $0x7c] sm:$0xf] %vm796_vm1, %v1381_v14 }
 0x1c0   :  { %1100 = vst.msk [vmem:[%s2747_s6 + $0x3c] sm:$0xf] %vm796_vm1, %v1397_v52  ;;  %1116 = vst.msk [vmem:[%s2747_s6 + $0x7c] sm:$0xf] %vm796_vm1, %v1413_v27 }
 0x1c1   :  { %845 = vrot.lane.b32.xlu0 %v2170_v42, %s1501_s18 }
 0x1c3   :  { %1131 = vrot.lane.b32.xlu1 %v2132_v31, %s1501_s18 }
 0x1c5   :  { %877 = vrot.lane.b32.xlu0 %v2172_v46, %s1501_s18 }
 0x1c7   :  { %1163 = vrot.lane.b32.xlu1 %v2139_v15, %s1501_s18 }
 0x1c9   :  { %1133 = vrot.lane.b32.xlu0 %v2176_v43, %s1501_s18 }
 0x1cb   :  { %847 = vrot.lane.b32.xlu1 %v2194_v47, %s1501_s18 }
 0x1cd   :  { %1165 = vrot.lane.b32.xlu0 %v2179_v49, %s1501_s18 }
 0x1cf   :  { %879 = vrot.lane.b32.xlu1 %v2196_v53, %s1501_s18 }
 0x1d1   :  { %849 = vrot.lane.b32.xlu0 %v2242_v10, %s1501_s18 }
 0x1d3   :  { %1135 = vrot.lane.b32.xlu1 %v2203_v54, %s1501_s18 }
 0x1d5   :  { %881 = vrot.lane.b32.xlu0 %v2244_v34, %s1501_s18 }
 0x1d7   :  { %1167 = vrot.lane.b32.xlu1 %v2210_v8, %s1501_s18 }
 0x1d9   :  { %1137 = vrot.lane.b32.xlu0 %v2248_v11, %s1501_s18 }
 0x1db   :  { %851 = vrot.lane.b32.xlu1 %v2266_v60, %s1501_s18 }
 0x1dd   :  { %1169 = vrot.lane.b32.xlu0 %v2251_v12, %s1501_s18 }
 0x1df   :  { %883 = vrot.lane.b32.xlu1 %v2268_v20, %s1501_s18 }
 0x1e1   :  { %853 = vrot.lane.b32.xlu0 %v2314_v23, %s1501_s18 }
 0x1e3   :  { %1139 = vrot.lane.b32.xlu1 %v2275_v55, %s1501_s18 }
 0x1e5   :  { %885 = vrot.lane.b32.xlu0 %v2316_v37, %s1501_s18 }
 0x1e7   :  { %1171 = vrot.lane.b32.xlu1 %v2282_v21, %s1501_s18 }
 0x1e9   :  { %1141 = vrot.lane.b32.xlu0 %v2320_v36, %s1501_s18 }
 0x1eb   :  { %855 = vrot.lane.b32.xlu1 %v2338_v56, %s1501_s18 }
 0x1ed   :  { %1173 = vrot.lane.b32.xlu0 %v2323_v48, %s1501_s18 }
 0x1ef   :  { %887 = vrot.lane.b32.xlu1 %v2340_v50, %s1501_s18 }
 0x1f1   :  { %857 = vrot.lane.b32.xlu0 %v1364_v4, %s1501_s18 }
 0x1f3   :  { %1143 = vrot.lane.b32.xlu1 %v2347_v19, %s1501_s18 }
 0x1f5   :  { %889 = vrot.lane.b32.xlu0 %v1380_v35, %s1501_s18 }
 0x1f7   :  { %1175 = vrot.lane.b32.xlu1 %v2354_v6, %s1501_s18  ;;  %v830_v40 = vpop.permute.xlu0 %829 }
 0x1f8   :  { %925 = vst.msk [vmem:[%s2748_s5] sm:$0xf] %vm796_vm1, %v830_v40 }
 0x1f9   :  { %v832_v31 = vpop.permute.xlu1 %831  ;;  %1145 = vrot.lane.b32.xlu0 %v1396_v16, %s1501_s18 }
 0x1fa   :  { %926 = vst.msk [vmem:[%s2748_s5 + $0x4] sm:$0xf] %vm796_vm1, %v832_v31 }
 0x1fb   :  { %859 = vrot.lane.b32.xlu1 %v1365_v28, %s1501_s18  ;;  %v862_v15 = vpop.permute.xlu0 %861 }
 0x1fc   :  { %941 = vst.msk [vmem:[%s2748_s5 + $0x40] sm:$0xf] %vm796_vm1, %v862_v15 }
 0x1fd   :  { %v864_v42 = vpop.permute.xlu1 %863  ;;  %1177 = vrot.lane.b32.xlu0 %v1412_v1, %s1501_s18 }
 0x1fe   :  { %942 = vst.msk [vmem:[%s2748_s5 + $0x44] sm:$0xf] %vm796_vm1, %v864_v42 }
 0x1ff   :  { %891 = vrot.lane.b32.xlu1 %v1381_v14, %s1501_s18  ;;  %v1118_v46 = vpop.permute.xlu0 %1117 }
 0x200   :  { %1213 = vst.msk [vmem:[%s2749_s7] sm:$0xf] %vm796_vm1, %v1118_v46 }
 0x201   :  { %v1120_v43 = vpop.permute.xlu1 %1119 }
 0x202   :  { %1214 = vst.msk [vmem:[%s2749_s7 + $0x4] sm:$0xf] %vm796_vm1, %v1120_v43 }
 0x203   :  { %1147 = vrot.lane.b32.xlu1 %v1397_v52, %s1501_s18  ;;  %v1150_v49 = vpop.permute.xlu0 %1149 }
 0x204   :  { %1229 = vst.msk [vmem:[%s2749_s7 + $0x40] sm:$0xf] %vm796_vm1, %v1150_v49 }
 0x205   :  { %v1152_v47 = vpop.permute.xlu1 %1151 }
 0x206   :  { %1230 = vst.msk [vmem:[%s2749_s7 + $0x44] sm:$0xf] %vm796_vm1, %v1152_v47 }
 0x207   :  { %1179 = vrot.lane.b32.xlu1 %v1413_v27, %s1501_s18  ;;  %v866_v53 = vpop.permute.xlu0 %865 }
 0x208   :  { %943 = vst.msk [vmem:[%s2748_s5 + $0x48] sm:$0xf] %vm796_vm1, %v866_v53 }
 0x209   :  { %v834_v54 = vpop.permute.xlu1 %833 }
 0x20a   :  { %927 = vst.msk [vmem:[%s2748_s5 + $0x8] sm:$0xf] %vm796_vm1, %v834_v54 }
 0x20b   :  { %v1122_v8 = vpop.permute.xlu0 %1121 }
 0x20c   :  { %1215 = vst.msk [vmem:[%s2749_s7 + $0x8] sm:$0xf] %vm796_vm1, %v1122_v8 }
 0x20d   :  { %v836_v10 = vpop.permute.xlu1 %835 }
 0x20e   :  { %928 = vst.msk [vmem:[%s2748_s5 + $0xc] sm:$0xf] %vm796_vm1, %v836_v10 }
 0x20f   :  { %v1154_v34 = vpop.permute.xlu0 %1153 }
 0x210   :  { %1231 = vst.msk [vmem:[%s2749_s7 + $0x48] sm:$0xf] %vm796_vm1, %v1154_v34 }
 0x211   :  { %v868_v11 = vpop.permute.xlu1 %867 }
 0x212   :  { %944 = vst.msk [vmem:[%s2748_s5 + $0x4c] sm:$0xf] %vm796_vm1, %v868_v11 }
 0x213   :  { %v838_v12 = vpop.permute.xlu0 %837 }
 0x214   :  { %929 = vst.msk [vmem:[%s2748_s5 + $0x10] sm:$0xf] %vm796_vm1, %v838_v12 }
 0x215   :  { %v1124_v60 = vpop.permute.xlu1 %1123 }
 0x216   :  { %1216 = vst.msk [vmem:[%s2749_s7 + $0xc] sm:$0xf] %vm796_vm1, %v1124_v60 }
 0x217   :  { %v870_v20 = vpop.permute.xlu0 %869 }
 0x218   :  { %945 = vst.msk [vmem:[%s2748_s5 + $0x50] sm:$0xf] %vm796_vm1, %v870_v20 }
 0x219   :  { %v1156_v55 = vpop.permute.xlu1 %1155 }
 0x21a   :  { %1232 = vst.msk [vmem:[%s2749_s7 + $0x4c] sm:$0xf] %vm796_vm1, %v1156_v55 }
 0x21b   :  { %v1126_v21 = vpop.permute.xlu0 %1125 }
 0x21c   :  { %1217 = vst.msk [vmem:[%s2749_s7 + $0x10] sm:$0xf] %vm796_vm1, %v1126_v21 }
 0x21d   :  { %v840_v30 = vpop.permute.xlu1 %839 }
 0x21e   :  { %930 = vst.msk [vmem:[%s2748_s5 + $0x14] sm:$0xf] %vm796_vm1, %v840_v30 }
 0x21f   :  { %v1158_v32 = vpop.permute.xlu0 %1157 }
 0x220   :  { %1233 = vst.msk [vmem:[%s2749_s7 + $0x50] sm:$0xf] %vm796_vm1, %v1158_v32 }
 0x221   :  { %v872_v2 = vpop.permute.xlu1 %871 }
 0x222   :  { %946 = vst.msk [vmem:[%s2748_s5 + $0x54] sm:$0xf] %vm796_vm1, %v872_v2 }
 0x223   :  { %v842_v41 = vpop.permute.xlu0 %841 }
 0x224   :  { %931 = vst.msk [vmem:[%s2748_s5 + $0x18] sm:$0xf] %vm796_vm1, %v842_v41 }
 0x225   :  { %v1128_v25 = vpop.permute.xlu1 %1127 }
 0x226   :  { %1218 = vst.msk [vmem:[%s2749_s7 + $0x14] sm:$0xf] %vm796_vm1, %v1128_v25 }
 0x227   :  { %v874_v22 = vpop.permute.xlu0 %873 }
 0x228   :  { %947 = vst.msk [vmem:[%s2748_s5 + $0x58] sm:$0xf] %vm796_vm1, %v874_v22 }
 0x229   :  { %v1160_v26 = vpop.permute.xlu1 %1159 }
 0x22a   :  { %1234 = vst.msk [vmem:[%s2749_s7 + $0x54] sm:$0xf] %vm796_vm1, %v1160_v26 }
 0x22b   :  { %v1130_v23 = vpop.permute.xlu0 %1129 }
 0x22c   :  { %1219 = vst.msk [vmem:[%s2749_s7 + $0x18] sm:$0xf] %vm796_vm1, %v1130_v23 }
 0x22d   :  { %v844_v37 = vpop.permute.xlu1 %843 }
 0x22e   :  { %932 = vst.msk [vmem:[%s2748_s5 + $0x1c] sm:$0xf] %vm796_vm1, %v844_v37 }
 0x22f   :  { %v1162_v18 = vpop.permute.xlu0 %1161 }
 0x230   :  { %1235 = vst.msk [vmem:[%s2749_s7 + $0x58] sm:$0xf] %vm796_vm1, %v1162_v18 }
 0x231   :  { %v876_v38 = vpop.permute.xlu1 %875 }
 0x232   :  { %948 = vst.msk [vmem:[%s2748_s5 + $0x5c] sm:$0xf] %vm796_vm1, %v876_v38 }
 0x233   :  { %v846_v39 = vpop.permute.xlu0 %845 }
 0x234   :  { %933 = vst.msk [vmem:[%s2748_s5 + $0x20] sm:$0xf] %vm796_vm1, %v846_v39 }
 0x235   :  { %v1132_v33 = vpop.permute.xlu1 %1131 }
 0x236   :  { %1220 = vst.msk [vmem:[%s2749_s7 + $0x1c] sm:$0xf] %vm796_vm1, %v1132_v33 }
 0x237   :  { %v878_v36 = vpop.permute.xlu0 %877 }
 0x238   :  { %949 = vst.msk [vmem:[%s2748_s5 + $0x60] sm:$0xf] %vm796_vm1, %v878_v36 }
 0x239   :  { %v1164_v45 = vpop.permute.xlu1 %1163 }
 0x23a   :  { %1236 = vst.msk [vmem:[%s2749_s7 + $0x5c] sm:$0xf] %vm796_vm1, %v1164_v45 }
 0x23b   :  { %v1134_v48 = vpop.permute.xlu0 %1133 }
 0x23c   :  { %1221 = vst.msk [vmem:[%s2749_s7 + $0x20] sm:$0xf] %vm796_vm1, %v1134_v48 }
 0x23d   :  { %v848_v44 = vpop.permute.xlu1 %847 }
 0x23e   :  { %934 = vst.msk [vmem:[%s2748_s5 + $0x24] sm:$0xf] %vm796_vm1, %v848_v44 }
 0x23f   :  { %v1166_v56 = vpop.permute.xlu0 %1165 }
 0x240   :  { %1237 = vst.msk [vmem:[%s2749_s7 + $0x60] sm:$0xf] %vm796_vm1, %v1166_v56 }
 0x241   :  { %v880_v50 = vpop.permute.xlu1 %879 }
 0x242   :  { %950 = vst.msk [vmem:[%s2748_s5 + $0x64] sm:$0xf] %vm796_vm1, %v880_v50 }
 0x243   :  { %v850_v19 = vpop.permute.xlu0 %849 }
 0x244   :  { %935 = vst.msk [vmem:[%s2748_s5 + $0x28] sm:$0xf] %vm796_vm1, %v850_v19 }
 0x245   :  { %v1136_v6 = vpop.permute.xlu1 %1135 }
 0x246   :  { %1222 = vst.msk [vmem:[%s2749_s7 + $0x24] sm:$0xf] %vm796_vm1, %v1136_v6 }
 0x247   :  { %v882_v62 = vpop.permute.xlu0 %881 }
 0x248   :  { %951 = vst.msk [vmem:[%s2748_s5 + $0x68] sm:$0xf] %vm796_vm1, %v882_v62 }
 0x249   :  { %v1168_v57 = vpop.permute.xlu1 %1167 }
 0x24a   :  { %1238 = vst.msk [vmem:[%s2749_s7 + $0x64] sm:$0xf] %vm796_vm1, %v1168_v57 }
 0x24b   :  { %v1138_v13 = vpop.permute.xlu0 %1137 }
 0x24c   :  { %1223 = vst.msk [vmem:[%s2749_s7 + $0x28] sm:$0xf] %vm796_vm1, %v1138_v13 }
 0x24d   :  { %v852_v51 = vpop.permute.xlu1 %851 }
 0x24e   :  { %936 = vst.msk [vmem:[%s2748_s5 + $0x2c] sm:$0xf] %vm796_vm1, %v852_v51 }
 0x24f   :  { %v1170_v9 = vpop.permute.xlu0 %1169 }
 0x250   :  { %1239 = vst.msk [vmem:[%s2749_s7 + $0x68] sm:$0xf] %vm796_vm1, %v1170_v9 }
 0x251   :  { %v884_v58 = vpop.permute.xlu1 %883 }
 0x252   :  { %952 = vst.msk [vmem:[%s2748_s5 + $0x6c] sm:$0xf] %vm796_vm1, %v884_v58 }
 0x253   :  { %v854_v59 = vpop.permute.xlu0 %853 }
 0x254   :  { %937 = vst.msk [vmem:[%s2748_s5 + $0x30] sm:$0xf] %vm796_vm1, %v854_v59 }
 0x255   :  { %v1140_v29 = vpop.permute.xlu1 %1139 }
 0x256   :  { %1224 = vst.msk [vmem:[%s2749_s7 + $0x2c] sm:$0xf] %vm796_vm1, %v1140_v29 }
 0x257   :  { %v886_v5 = vpop.permute.xlu0 %885 }
 0x258   :  { %953 = vst.msk [vmem:[%s2748_s5 + $0x70] sm:$0xf] %vm796_vm1, %v886_v5 }
 0x259   :  { %v1172_v7 = vpop.permute.xlu1 %1171 }
 0x25a   :  { %1240 = vst.msk [vmem:[%s2749_s7 + $0x6c] sm:$0xf] %vm796_vm1, %v1172_v7 }
 0x25b   :  { %v1142_v4 = vpop.permute.xlu0 %1141 }
 0x25c   :  { %1225 = vst.msk [vmem:[%s2749_s7 + $0x30] sm:$0xf] %vm796_vm1, %v1142_v4 }
 0x25d   :  { %v856_v35 = vpop.permute.xlu1 %855 }
 0x25e   :  { %938 = vst.msk [vmem:[%s2748_s5 + $0x34] sm:$0xf] %vm796_vm1, %v856_v35 }
 0x25f   :  { %v1174_v63 = vpop.permute.xlu0 %1173 }
 0x260   :  { %1241 = vst.msk [vmem:[%s2749_s7 + $0x70] sm:$0xf] %vm796_vm1, %v1174_v63 }
 0x261   :  { %v888_v17 = vpop.permute.xlu1 %887 }
 0x262   :  { %954 = vst.msk [vmem:[%s2748_s5 + $0x74] sm:$0xf] %vm796_vm1, %v888_v17 }
 0x263   :  { %v858_v3 = vpop.permute.xlu0 %857 }
 0x264   :  { %939 = vst.msk [vmem:[%s2748_s5 + $0x38] sm:$0xf] %vm796_vm1, %v858_v3 }
 0x265   :  { %v1144_v0 = vpop.permute.xlu1 %1143 }
 0x266   :  { %1226 = vst.msk [vmem:[%s2749_s7 + $0x34] sm:$0xf] %vm796_vm1, %v1144_v0 }
 0x267   :  { %v890_v16 = vpop.permute.xlu0 %889 }
 0x268   :  { %955 = vst.msk [vmem:[%s2748_s5 + $0x78] sm:$0xf] %vm796_vm1, %v890_v16 }
 0x269   :  { %v1176_v61 = vpop.permute.xlu1 %1175 }
 0x26a   :  { %1242 = vst.msk [vmem:[%s2749_s7 + $0x74] sm:$0xf] %vm796_vm1, %v1176_v61 }
 0x26b   :  { %v1146_v1 = vpop.permute.xlu0 %1145 }
 0x26c   :  { %1227 = vst.msk [vmem:[%s2749_s7 + $0x38] sm:$0xf] %vm796_vm1, %v1146_v1 }
 0x26d   :  { %v860_v24 = vpop.permute.xlu1 %859 }
 0x26e   :  { %940 = vst.msk [vmem:[%s2748_s5 + $0x3c] sm:$0xf] %vm796_vm1, %v860_v24 }
 0x26f   :  { %v1178_v28 = vpop.permute.xlu0 %1177 }
 0x270   :  { %1243 = vst.msk [vmem:[%s2749_s7 + $0x78] sm:$0xf] %vm796_vm1, %v1178_v28 }
 0x271   :  { %v892_v14 = vpop.permute.xlu1 %891 }
 0x272   :  { %956 = vst.msk [vmem:[%s2748_s5 + $0x7c] sm:$0xf] %vm796_vm1, %v892_v14 }
 0x275   :  { %v1148_v52 = vpop.permute.xlu1 %1147 }
 0x276   :  { %1228 = vst.msk [vmem:[%s2749_s7 + $0x3c] sm:$0xf] %vm796_vm1, %v1148_v52 }
 0x279   :  { %v1180_v27 = vpop.permute.xlu1 %1179 }
 0x27a   :  { %1244 = vst.msk [vmem:[%s2749_s7 + $0x7c] sm:$0xf] %vm796_vm1, %v1180_v27 }

</bundles_post_ra>
